<compile_context>
chip_gen: v5e
topology: v5e:2x2
jax: 0.10.0
libtpu: 0.0.40
codegen_flags: <defaults>
</compile_context>

<pallas_src>
import functools

import jax
import jax.numpy as jnp
from jax.experimental import pallas as pl
from jax.experimental.pallas import tpu as pltpu


_MATMUL_DTYPE = jnp.bfloat16          # MXU operand dtype (accumulation is always f32)
_VMEM_LIMIT_BYTES = 48 * 1024 * 1024  # portable: fits v7x 64 MiB; v5e/v6e have headroom


def _pick_tile(dim, target):
    """Largest tile <= target that divides dim (falls back to the full dim)."""
    if dim <= target:
        return dim
    t = target
    while t >= 8:
        if dim % t == 0:
            return t
        t //= 2
    return dim


# ------------------------- in-kernel attention core ------------------------ #

def _mha_heads(q2d, k2d, v2d, num_heads, scale, dot_dtype):
    """Multi-head attention on lane-dense (rows, C) operands.

    q2d: (Nq, C) f32, k2d/v2d: (Nk, C) f32 or dot_dtype.  Returns (Nq, C) f32.
    One batched matmul pair over the head axis; casts and the softmax scale are
    applied once (hoisted), not per head.
    """
    nq, c = q2d.shape
    nk = k2d.shape[0]
    d = c // num_heads
    # Hoisted: fold the scale into q once on (Nq, C); cast each operand once.
    qh = jnp.swapaxes((q2d * scale).astype(dot_dtype).reshape(nq, num_heads, d), 0, 1)
    kh = jnp.swapaxes(k2d.astype(dot_dtype).reshape(nk, num_heads, d), 0, 1)
    vh = jnp.swapaxes(v2d.astype(dot_dtype).reshape(nk, num_heads, d), 0, 1)
    # Batched QK^T contracting the last dims (no materialized k.T).
    s = jnp.einsum("hqd,hkd->hqk", qh, kh,
                   preferred_element_type=jnp.float32)            # (H, Nq, Nk) f32
    m = jnp.max(s, axis=-1, keepdims=True)
    p = jnp.exp(s - m)                                            # f32 softmax math
    inv = pl.reciprocal(jnp.sum(p, axis=-1, keepdims=True), approx=True)
    o = jnp.einsum("hqk,hkd->hqd", p.astype(dot_dtype), vh,
                   preferred_element_type=jnp.float32)            # (H, Nq, d) f32
    o = o * inv                                                   # fold 1/denom here
    return jnp.swapaxes(o, 0, 1).reshape(nq, c)                   # (Nq, C), lane-dense


# ------------------------------ Pallas kernels ------------------------------ #

def _local_branch_kernel(x_ref, w_kv_ref, b_kv_ref, w_qkv_ref, b_qkv_ref,
                         w_pr_ref, b_pr_ref, o_ref, *, num_heads, scale):
    """One batch step: BOTH outer k/v projections + both full local Attentions."""
    c = x_ref.shape[2]
    dd = w_kv_ref.dtype
    x = x_ref[0]                                              # (NK, C) bf16, read once
    for br in range(2):                                       # k-branch, v-branch
        # Outer k- or v-projection.
        h = jnp.dot(x, w_kv_ref[br], preferred_element_type=jnp.float32) + b_kv_ref[br]
        # Fused local QKV projection: one (NK, C) x (C, 3C) MXU pass.
        qkv = jnp.dot(h.astype(dd), w_qkv_ref[br],
                      preferred_element_type=jnp.float32) + b_qkv_ref[br]
        ctx = _mha_heads(qkv[:, :c], qkv[:, c:2 * c], qkv[:, 2 * c:],
                         num_heads, scale, dd)                # (NK, C) f32
        out = jnp.dot(ctx.astype(dd), w_pr_ref[br],
                      preferred_element_type=jnp.float32) + b_pr_ref[br]
        o_ref[br, 0] = out.astype(o_ref.dtype)                # bf16 writeback


def _cross_attn_kernel(x_ref, w_q_ref, b_q_ref, kv_ref, w_pr_ref, b_pr_ref,
                       o_ref, *, num_heads, scale):
    """One (batch, query-tile) step: q projection + cross-attention + out proj."""
    dd = w_q_ref.dtype
    x = x_ref[0]                                              # (TQ, C) bf16
    q = jnp.dot(x, w_q_ref[...], preferred_element_type=jnp.float32) + b_q_ref[...]
    k = kv_ref[0, 0]                                          # (NK, C) bf16 (dot dtype)
    v = kv_ref[1, 0]                                          # (NK, C) bf16
    ctx = _mha_heads(q, k, v, num_heads, scale, dd)           # (TQ, C) f32
    out = jnp.dot(ctx.astype(dd), w_pr_ref[...],
                  preferred_element_type=jnp.float32) + b_pr_ref[...]
    o_ref[0] = out.astype(o_ref.dtype)


# ------------------------------ module forward ------------------------------ #

def _prep_params(p, dot_dtype):
    """Host-side packing: fuse the local QKV weights, stack the two branches."""
    C = p["q_w"].shape[0]
    lk, lv = p["local_k_attn"], p["local_v_attn"]

    def fqkv_w(a):
        return jnp.concatenate([a["q_w"], a["k_w"], a["v_w"]], axis=1)   # (C, 3C)

    def fqkv_b(a):
        return jnp.concatenate([a["q_b"], a["k_b"], a["v_b"]], axis=0)   # (3C,)

    return {
        # outer k / v projections feeding the two local branches (stacked axis 0)
        "w_kv": jnp.stack([p["k_w"], p["v_w"]]).astype(dot_dtype),       # (2, C, C)
        "b_kv": jnp.stack([p["k_b"], p["v_b"]]).reshape(2, 1, C),        # f32
        # local Attention weights: fused QKV, stacked (k-branch, v-branch)
        "w_lqkv": jnp.stack([fqkv_w(lk), fqkv_w(lv)]).astype(dot_dtype), # (2, C, 3C)
        "b_lqkv": jnp.stack([fqkv_b(lk), fqkv_b(lv)]).reshape(2, 1, 3 * C),
        "w_lpr": jnp.stack([lk["proj_w"], lv["proj_w"]]).astype(dot_dtype),
        "b_lpr": jnp.stack([lk["proj_b"], lv["proj_b"]]).reshape(2, 1, C),
        # outer q projection and final output projection
        "w_q": p["q_w"].astype(dot_dtype), "b_q": p["q_b"].reshape(1, C),
        "w_pr": p["proj_w"].astype(dot_dtype), "b_pr": p["proj_b"].reshape(1, C),
    }


def k_attention_forward(params, x, num_heads, K, dot_dtype=_MATMUL_DTYPE):
    """Equivalent of K_Attention.forward (dropout p=0.0 -> identity)."""
    B, N, C = x.shape
    NK = N // K
    D = C // num_heads
    scale = D ** -0.5
    pp = _prep_params(params, dot_dtype)
    xc = x.astype(dot_dtype)

    # ---- local branches: only chunk 0 ([:, 0, :, :]) of each batch is ever used
    # downstream, and it depends only on x[:, :NK, :].  Both branches are fused
    # into one grid step per batch.
    x0 = xc[:, :NK, :]                                        # (B, NK, C)
    local_kernel = functools.partial(_local_branch_kernel,
                                     num_heads=num_heads, scale=scale)
    kv_local = pl.pallas_call(
        local_kernel,
        grid=(B,),                                            # (batch,)
        in_specs=[
            pl.BlockSpec((1, NK, C), lambda b: (b, 0, 0)),
            pl.BlockSpec((2, C, C), lambda b: (0, 0, 0)),
            pl.BlockSpec((2, 1, C), lambda b: (0, 0, 0)),
            pl.BlockSpec((2, C, 3 * C), lambda b: (0, 0, 0)),
            pl.BlockSpec((2, 1, 3 * C), lambda b: (0, 0, 0)),
            pl.BlockSpec((2, C, C), lambda b: (0, 0, 0)),
            pl.BlockSpec((2, 1, C), lambda b: (0, 0, 0)),
        ],
        out_specs=pl.BlockSpec((2, 1, NK, C), lambda b: (0, b, 0, 0)),
        out_shape=jax.ShapeDtypeStruct((2, B, NK, C), dot_dtype),   # bf16 kv round-trip
        compiler_params=pltpu.CompilerParams(
            dimension_semantics=("parallel",),
            vmem_limit_bytes=_VMEM_LIMIT_BYTES),
    )(x0, pp["w_kv"], pp["b_kv"], pp["w_lqkv"], pp["b_lqkv"],
      pp["w_lpr"], pp["b_lpr"])

    # ---- outer cross-attention: q over the full sequence (tiled along N),
    # k/v come straight from the local-branch kernel output (bf16, no transpose).
    TQ = _pick_tile(N, 512)   # 512-target for v5e/v6e headroom; stays a 128-multiple
    cross_kernel = functools.partial(_cross_attn_kernel,
                                     num_heads=num_heads, scale=scale)
    out = pl.pallas_call(
        cross_kernel,
        grid=(B, N // TQ),                                    # (batch, query tile)
        in_specs=[
            pl.BlockSpec((1, TQ, C), lambda b, qi: (b, qi, 0)),
            pl.BlockSpec((C, C), lambda b, qi: (0, 0)),
            pl.BlockSpec((1, C), lambda b, qi: (0, 0)),
            pl.BlockSpec((2, 1, NK, C), lambda b, qi: (0, b, 0, 0)),
            pl.BlockSpec((C, C), lambda b, qi: (0, 0)),
            pl.BlockSpec((1, C), lambda b, qi: (0, 0)),
        ],
        out_specs=pl.BlockSpec((1, TQ, C), lambda b, qi: (b, qi, 0)),
        out_shape=jax.ShapeDtypeStruct((B, N, C), jnp.float32),
        compiler_params=pltpu.CompilerParams(
            dimension_semantics=("parallel", "parallel"),
            vmem_limit_bytes=_VMEM_LIMIT_BYTES),
    )(xc, pp["w_q"], pp["b_q"], kv_local, pp["w_pr"], pp["b_pr"])
    return out


# ----------------------------- parameter init ------------------------------ #

def init_linear(key, cin, cout, bias=True, std=0.1):
    kw, kb = jax.random.split(key)
    w = jax.random.normal(kw, (cin, cout), jnp.float32) * std   # (Cin, Cout) = torch W.T
    if bias:
        b = jax.random.normal(kb, (cout,), jnp.float32) * std
    else:
        b = jnp.zeros((cout,), jnp.float32)
    return w, b


def init_attention(key, dim, qkv_bias=False):
    ks = jax.random.split(key, 4)
    qw, qb = init_linear(ks[0], dim, dim, bias=qkv_bias)
    kw, kb = init_linear(ks[1], dim, dim, bias=qkv_bias)
    vw, vb = init_linear(ks[2], dim, dim, bias=qkv_bias)
    pw, pb = init_linear(ks[3], dim, dim, bias=True)
    return {"q_w": qw, "q_b": qb, "k_w": kw, "k_b": kb,
            "v_w": vw, "v_b": vb, "proj_w": pw, "proj_b": pb}


def init_k_attention(key, dim, qkv_bias=False):
    ks = jax.random.split(key, 6)
    qw, qb = init_linear(ks[0], dim, dim, bias=qkv_bias)
    kw, kb = init_linear(ks[1], dim, dim, bias=qkv_bias)
    vw, vb = init_linear(ks[2], dim, dim, bias=qkv_bias)
    pw, pb = init_linear(ks[3], dim, dim, bias=True)
    return {"q_w": qw, "q_b": qb, "k_w": kw, "k_b": kb,
            "v_w": vw, "v_b": vb, "proj_w": pw, "proj_b": pb,
            "local_k_attn": init_attention(ks[4], dim, qkv_bias),
            "local_v_attn": init_attention(ks[5], dim, qkv_bias)}


# ------------------------- pure-JAX reference check ------------------------ #

def _ref_attn(p, x, num_heads):
    B, N, C = x.shape
    D = C // num_heads
    scale = D ** -0.5
    lin = lambda y, w, b: y @ w + b
    q = lin(x, p["q_w"], p["q_b"]).reshape(B, N, num_heads, D).transpose(0, 2, 1, 3)
    k = lin(x, p["k_w"], p["k_b"]).reshape(B, N, num_heads, D).transpose(0, 2, 1, 3)
    v = lin(x, p["v_w"], p["v_b"]).reshape(B, N, num_heads, D).transpose(0, 2, 1, 3)
    a = jax.nn.softmax(jnp.einsum("bhnd,bhmd->bhnm", q, k) * scale, axis=-1)
    o = jnp.einsum("bhnm,bhmd->bhnd", a, v).transpose(0, 2, 1, 3).reshape(B, N, C)
    return lin(o, p["proj_w"], p["proj_b"])


def _ref_k_attn(p, x, num_heads, K):
    B, N, C = x.shape
    D = C // num_heads
    scale = D ** -0.5
    NK = N // K
    lin = lambda y, w, b: y @ w + b
    q = lin(x, p["q_w"], p["q_b"]).reshape(B, N, num_heads, D).transpose(0, 2, 1, 3)
    k = lin(x, p["k_w"], p["k_b"]).reshape(B * K, NK, C)
    k = _ref_attn(p["local_k_attn"], k, num_heads).reshape(B, K, NK, C)[:, 0]
    k = k.reshape(B, NK, num_heads, D).transpose(0, 2, 1, 3)
    v = lin(x, p["v_w"], p["v_b"]).reshape(B * K, NK, C)
    v = _ref_attn(p["local_v_attn"], v, num_heads).reshape(B, K, NK, C)[:, 0]
    v = v.reshape(B, NK, num_heads, D).transpose(0, 2, 1, 3)
    a = jax.nn.softmax(jnp.einsum("bhnd,bhmd->bhnm", q, k) * scale, axis=-1)
    o = jnp.einsum("bhnm,bhmd->bhnd", a, v).transpose(0, 2, 1, 3).reshape(B, N, C)
    return lin(o, p["proj_w"], p["proj_b"])


# ---------------------------------- main ----------------------------------- #

if __name__ == "__main__":
    B, N, C = 2, 16, 32
    num_heads, K = 4, 4          # head_dim = 8, chunk length N // K = 4

    root = jax.random.PRNGKey(0)
    k_params, k_x = jax.random.split(root)
    params = init_k_attention(k_params, C, qkv_bias=False)
    x = jax.random.normal(k_x, (B, N, C), jnp.float32)

    fwd = jax.jit(functools.partial(k_attention_forward, num_heads=num_heads, K=K))
    out = jax.block_until_ready(fwd(params, x))

    ref = _ref_k_attn(params, x, num_heads, K)
    assert out.shape == (B, N, C)
    err = float(jnp.max(jnp.abs(out - ref)))
    ref_scale = float(jnp.max(jnp.abs(ref)))
    # bf16 MXU operands (f32 accumulation) + approx-reciprocal softmax -> ~1% error
    assert err <= 0.05 * ref_scale + 1e-6, (err, ref_scale)
    print("KERNEL_OK")
</pallas_src>

<mosaic_0001>
module attributes {stable_mosaic.version = 11 : i64} {
  func.func @_local_branch_kernel(%arg0: i32, %arg1: memref<1x4x32xbf16, #tpu.memory_space<vmem>>, %arg2: memref<2x32x32xbf16, #tpu.memory_space<vmem>>, %arg3: memref<2x1x32xf32, #tpu.memory_space<vmem>>, %arg4: memref<2x32x96xbf16, #tpu.memory_space<vmem>>, %arg5: memref<2x1x96xf32, #tpu.memory_space<vmem>>, %arg6: memref<2x32x32xbf16, #tpu.memory_space<vmem>>, %arg7: memref<2x1x32xf32, #tpu.memory_space<vmem>>, %arg8: memref<2x1x4x32xbf16, #tpu.memory_space<vmem>>) attributes {dimension_semantics = [#tpu.dimension_semantics<parallel>], iteration_bounds = array<i64: 2>, scalar_prefetch = 0 : i64, scratch_operands = 0 : i64, tpu.core_type = #tpu.core_type<tc>, window_params = [{transform_indices = @transform_0, window_bounds = array<i64: 1, 4, 32>}, {pipeline_mode = #tpu.pipeline_mode<synchronous>, transform_indices = @transform_1, window_bounds = array<i64: 2, 32, 32>}, {pipeline_mode = #tpu.pipeline_mode<synchronous>, transform_indices = @transform_2, window_bounds = array<i64: 2, 1, 32>}, {pipeline_mode = #tpu.pipeline_mode<synchronous>, transform_indices = @transform_3, window_bounds = array<i64: 2, 32, 96>}, {pipeline_mode = #tpu.pipeline_mode<synchronous>, transform_indices = @transform_4, window_bounds = array<i64: 2, 1, 96>}, {pipeline_mode = #tpu.pipeline_mode<synchronous>, transform_indices = @transform_5, window_bounds = array<i64: 2, 32, 32>}, {pipeline_mode = #tpu.pipeline_mode<synchronous>, transform_indices = @transform_6, window_bounds = array<i64: 2, 1, 32>}, {transform_indices = @transform_7, window_bounds = array<i64: 2, 1, 4, 32>}]} {
    %c0 = arith.constant 0 : index
    %c0_0 = arith.constant 0 : index
    %c0_1 = arith.constant 0 : index
    %0 = vector.load %arg1[%c0, %c0_0, %c0_1] : memref<1x4x32xbf16, #tpu.memory_space<vmem>>, vector<1x4x32xbf16>
    %1 = vector.shape_cast %0 : vector<1x4x32xbf16> to vector<4x32xbf16>
    %c0_2 = arith.constant 0 : index
    %c0_3 = arith.constant 0 : index
    %c0_4 = arith.constant 0 : index
    %2 = vector.load %arg2[%c0_2, %c0_3, %c0_4] : memref<2x32x32xbf16, #tpu.memory_space<vmem>>, vector<1x32x32xbf16>
    %3 = vector.shape_cast %2 : vector<1x32x32xbf16> to vector<32x32xbf16>
    %cst = arith.constant dense<0.000000e+00> : vector<4x32xf32>
    %4 = tpu.matmul %1, %3, %cst {dimension_numbers = #tpu.dot_dimension_numbers<[1], [0], [0], [1], [0, 0, 1, 1], [], []>} : vector<4x32xbf16>, vector<32x32xbf16>, vector<4x32xf32> -> vector<4x32xf32>
    %c0_5 = arith.constant 0 : index
    %c0_6 = arith.constant 0 : index
    %c0_7 = arith.constant 0 : index
    %5 = vector.load %arg3[%c0_5, %c0_6, %c0_7] : memref<2x1x32xf32, #tpu.memory_space<vmem>>, vector<1x1x32xf32>
    %6 = vector.shape_cast %5 : vector<1x1x32xf32> to vector<1x32xf32>
    %7 = vector.broadcast %6 : vector<1x32xf32> to vector<4x32xf32>
    %8 = arith.addf %4, %7 : vector<4x32xf32>
    %9 = arith.truncf %8 : vector<4x32xf32> to vector<4x32xbf16>
    %c0_8 = arith.constant 0 : index
    %c0_9 = arith.constant 0 : index
    %c0_10 = arith.constant 0 : index
    %10 = vector.load %arg4[%c0_8, %c0_9, %c0_10] : memref<2x32x96xbf16, #tpu.memory_space<vmem>>, vector<1x32x96xbf16>
    %11 = vector.shape_cast %10 : vector<1x32x96xbf16> to vector<32x96xbf16>
    %cst_11 = arith.constant dense<0.000000e+00> : vector<4x96xf32>
    %12 = tpu.matmul %9, %11, %cst_11 {dimension_numbers = #tpu.dot_dimension_numbers<[1], [0], [0], [1], [0, 0, 1, 1], [], []>} : vector<4x32xbf16>, vector<32x96xbf16>, vector<4x96xf32> -> vector<4x96xf32>
    %c0_12 = arith.constant 0 : index
    %c0_13 = arith.constant 0 : index
    %c0_14 = arith.constant 0 : index
    %13 = vector.load %arg5[%c0_12, %c0_13, %c0_14] : memref<2x1x96xf32, #tpu.memory_space<vmem>>, vector<1x1x96xf32>
    %14 = vector.shape_cast %13 : vector<1x1x96xf32> to vector<1x96xf32>
    %15 = vector.broadcast %14 : vector<1x96xf32> to vector<4x96xf32>
    %16 = arith.addf %12, %15 : vector<4x96xf32>
    %17 = vector.extract_strided_slice %16 {offsets = [0, 0], sizes = [4, 32], strides = [1, 1]} : vector<4x96xf32> to vector<4x32xf32>
    %18 = vector.extract_strided_slice %16 {offsets = [0, 32], sizes = [4, 32], strides = [1, 1]} : vector<4x96xf32> to vector<4x32xf32>
    %19 = vector.extract_strided_slice %16 {offsets = [0, 64], sizes = [4, 32], strides = [1, 1]} : vector<4x96xf32> to vector<4x32xf32>
    %cst_15 = arith.constant 0.353553385 : f32
    %20 = vector.broadcast %cst_15 : f32 to vector<4x32xf32>
    %21 = arith.mulf %17, %20 : vector<4x32xf32>
    %22 = arith.truncf %21 : vector<4x32xf32> to vector<4x32xbf16>
    %23 = vector.shape_cast %22 : vector<4x32xbf16> to vector<4x4x8xbf16>
    %24 = tpu.transpose %23, [1, 0, 2] : vector<4x4x8xbf16> -> vector<4x4x8xbf16>
    %25 = arith.truncf %18 : vector<4x32xf32> to vector<4x32xbf16>
    %26 = vector.shape_cast %25 : vector<4x32xbf16> to vector<4x4x8xbf16>
    %27 = tpu.transpose %26, [1, 0, 2] : vector<4x4x8xbf16> -> vector<4x4x8xbf16>
    %28 = arith.truncf %19 : vector<4x32xf32> to vector<4x32xbf16>
    %29 = vector.shape_cast %28 : vector<4x32xbf16> to vector<4x4x8xbf16>
    %30 = tpu.transpose %29, [1, 0, 2] : vector<4x4x8xbf16> -> vector<4x4x8xbf16>
    "tpu.trace_start"() <{level = 10 : i32, message = "hqd,hkd->hqk"}> : () -> ()
    %cst_16 = arith.constant dense<0.000000e+00> : vector<4x4x4xf32>
    %31 = tpu.matmul %24, %27, %cst_16 {dimension_numbers = #tpu.dot_dimension_numbers<[2], [2], [1], [1], [0, 0, 0, 1, 1, 1], [0], [0]>} : vector<4x4x8xbf16>, vector<4x4x8xbf16>, vector<4x4x4xf32> -> vector<4x4x4xf32>
    "tpu.trace_stop"() : () -> ()
    %cst_17 = arith.constant dense<0xFF800000> : vector<4x4xf32>
    %32 = vector.multi_reduction <maximumf>, %31, %cst_17 [2] : vector<4x4x4xf32> to vector<4x4xf32>
    %33 = vector.shape_cast %32 : vector<4x4xf32> to vector<4x4x1xf32>
    %34 = vector.broadcast %33 : vector<4x4x1xf32> to vector<4x4x4xf32>
    %35 = arith.subf %31, %34 : vector<4x4x4xf32>
    %36 = math.exp %35 : vector<4x4x4xf32>
    %cst_18 = arith.constant dense<0.000000e+00> : vector<4x4xf32>
    %37 = vector.multi_reduction <add>, %36, %cst_18 [2] : vector<4x4x4xf32> to vector<4x4xf32>
    %38 = vector.shape_cast %37 : vector<4x4xf32> to vector<4x4x1xf32>
    %39 = tpu.reciprocal %38 {approx = true} : vector<4x4x1xf32> -> vector<4x4x1xf32>
    %40 = arith.truncf %36 : vector<4x4x4xf32> to vector<4x4x4xbf16>
    "tpu.trace_start"() <{level = 10 : i32, message = "hqk,hkd->hqd"}> : () -> ()
    %cst_19 = arith.constant dense<0.000000e+00> : vector<4x4x8xf32>
    %41 = tpu.matmul %40, %30, %cst_19 {dimension_numbers = #tpu.dot_dimension_numbers<[2], [1], [1], [2], [0, 0, 0, 1, 1, 2], [0], [0]>} : vector<4x4x4xbf16>, vector<4x4x8xbf16>, vector<4x4x8xf32> -> vector<4x4x8xf32>
    "tpu.trace_stop"() : () -> ()
    %42 = vector.broadcast %39 : vector<4x4x1xf32> to vector<4x4x8xf32>
    %43 = arith.mulf %41, %42 : vector<4x4x8xf32>
    %44 = tpu.transpose %43, [1, 0, 2] : vector<4x4x8xf32> -> vector<4x4x8xf32>
    %45 = vector.shape_cast %44 : vector<4x4x8xf32> to vector<4x32xf32>
    %46 = arith.truncf %45 : vector<4x32xf32> to vector<4x32xbf16>
    %c0_20 = arith.constant 0 : index
    %c0_21 = arith.constant 0 : index
    %c0_22 = arith.constant 0 : index
    %47 = vector.load %arg6[%c0_20, %c0_21, %c0_22] : memref<2x32x32xbf16, #tpu.memory_space<vmem>>, vector<1x32x32xbf16>
    %48 = vector.shape_cast %47 : vector<1x32x32xbf16> to vector<32x32xbf16>
    %cst_23 = arith.constant dense<0.000000e+00> : vector<4x32xf32>
    %49 = tpu.matmul %46, %48, %cst_23 {dimension_numbers = #tpu.dot_dimension_numbers<[1], [0], [0], [1], [0, 0, 1, 1], [], []>} : vector<4x32xbf16>, vector<32x32xbf16>, vector<4x32xf32> -> vector<4x32xf32>
    %c0_24 = arith.constant 0 : index
    %c0_25 = arith.constant 0 : index
    %c0_26 = arith.constant 0 : index
    %50 = vector.load %arg7[%c0_24, %c0_25, %c0_26] : memref<2x1x32xf32, #tpu.memory_space<vmem>>, vector<1x1x32xf32>
    %51 = vector.shape_cast %50 : vector<1x1x32xf32> to vector<1x32xf32>
    %52 = vector.broadcast %51 : vector<1x32xf32> to vector<4x32xf32>
    %53 = arith.addf %49, %52 : vector<4x32xf32>
    %54 = arith.truncf %53 : vector<4x32xf32> to vector<4x32xbf16>
    %c0_27 = arith.constant 0 : index
    %c0_28 = arith.constant 0 : index
    %c0_29 = arith.constant 0 : index
    %c0_30 = arith.constant 0 : index
    %55 = vector.load %arg8[%c0_27, %c0_28, %c0_29, %c0_30] : memref<2x1x4x32xbf16, #tpu.memory_space<vmem>>, vector<1x1x4x32xbf16>
    %56 = vector.shape_cast %55 : vector<1x1x4x32xbf16> to vector<4x32xbf16>
    %57 = vector.shape_cast %54 : vector<4x32xbf16> to vector<1x1x4x32xbf16>
    tpu.vector_store %arg8[%c0_27, %c0_28, %c0_29, %c0_30], %57 {strides = array<i32>} : memref<2x1x4x32xbf16, #tpu.memory_space<vmem>>, vector<1x1x4x32xbf16>,
    %c1 = arith.constant 1 : index
    %c0_31 = arith.constant 0 : index
    %c0_32 = arith.constant 0 : index
    %58 = vector.load %arg2[%c1, %c0_31, %c0_32] : memref<2x32x32xbf16, #tpu.memory_space<vmem>>, vector<1x32x32xbf16>
    %59 = vector.shape_cast %58 : vector<1x32x32xbf16> to vector<32x32xbf16>
    %cst_33 = arith.constant dense<0.000000e+00> : vector<4x32xf32>
    %60 = tpu.matmul %1, %59, %cst_33 {dimension_numbers = #tpu.dot_dimension_numbers<[1], [0], [0], [1], [0, 0, 1, 1], [], []>} : vector<4x32xbf16>, vector<32x32xbf16>, vector<4x32xf32> -> vector<4x32xf32>
    %c1_34 = arith.constant 1 : index
    %c0_35 = arith.constant 0 : index
    %c0_36 = arith.constant 0 : index
    %61 = vector.load %arg3[%c1_34, %c0_35, %c0_36] : memref<2x1x32xf32, #tpu.memory_space<vmem>>, vector<1x1x32xf32>
    %62 = vector.shape_cast %61 : vector<1x1x32xf32> to vector<1x32xf32>
    %63 = vector.broadcast %62 : vector<1x32xf32> to vector<4x32xf32>
    %64 = arith.addf %60, %63 : vector<4x32xf32>
    %65 = arith.truncf %64 : vector<4x32xf32> to vector<4x32xbf16>
    %c1_37 = arith.constant 1 : index
    %c0_38 = arith.constant 0 : index
    %c0_39 = arith.constant 0 : index
    %66 = vector.load %arg4[%c1_37, %c0_38, %c0_39] : memref<2x32x96xbf16, #tpu.memory_space<vmem>>, vector<1x32x96xbf16>
    %67 = vector.shape_cast %66 : vector<1x32x96xbf16> to vector<32x96xbf16>
    %cst_40 = arith.constant dense<0.000000e+00> : vector<4x96xf32>
    %68 = tpu.matmul %65, %67, %cst_40 {dimension_numbers = #tpu.dot_dimension_numbers<[1], [0], [0], [1], [0, 0, 1, 1], [], []>} : vector<4x32xbf16>, vector<32x96xbf16>, vector<4x96xf32> -> vector<4x96xf32>
    %c1_41 = arith.constant 1 : index
    %c0_42 = arith.constant 0 : index
    %c0_43 = arith.constant 0 : index
    %69 = vector.load %arg5[%c1_41, %c0_42, %c0_43] : memref<2x1x96xf32, #tpu.memory_space<vmem>>, vector<1x1x96xf32>
    %70 = vector.shape_cast %69 : vector<1x1x96xf32> to vector<1x96xf32>
    %71 = vector.broadcast %70 : vector<1x96xf32> to vector<4x96xf32>
    %72 = arith.addf %68, %71 : vector<4x96xf32>
    %73 = vector.extract_strided_slice %72 {offsets = [0, 0], sizes = [4, 32], strides = [1, 1]} : vector<4x96xf32> to vector<4x32xf32>
    %74 = vector.extract_strided_slice %72 {offsets = [0, 32], sizes = [4, 32], strides = [1, 1]} : vector<4x96xf32> to vector<4x32xf32>
    %75 = vector.extract_strided_slice %72 {offsets = [0, 64], sizes = [4, 32], strides = [1, 1]} : vector<4x96xf32> to vector<4x32xf32>
    %cst_44 = arith.constant 0.353553385 : f32
    %76 = vector.broadcast %cst_44 : f32 to vector<4x32xf32>
    %77 = arith.mulf %73, %76 : vector<4x32xf32>
    %78 = arith.truncf %77 : vector<4x32xf32> to vector<4x32xbf16>
    %79 = vector.shape_cast %78 : vector<4x32xbf16> to vector<4x4x8xbf16>
    %80 = tpu.transpose %79, [1, 0, 2] : vector<4x4x8xbf16> -> vector<4x4x8xbf16>
    %81 = arith.truncf %74 : vector<4x32xf32> to vector<4x32xbf16>
    %82 = vector.shape_cast %81 : vector<4x32xbf16> to vector<4x4x8xbf16>
    %83 = tpu.transpose %82, [1, 0, 2] : vector<4x4x8xbf16> -> vector<4x4x8xbf16>
    %84 = arith.truncf %75 : vector<4x32xf32> to vector<4x32xbf16>
    %85 = vector.shape_cast %84 : vector<4x32xbf16> to vector<4x4x8xbf16>
    %86 = tpu.transpose %85, [1, 0, 2] : vector<4x4x8xbf16> -> vector<4x4x8xbf16>
    "tpu.trace_start"() <{level = 10 : i32, message = "hqd,hkd->hqk"}> : () -> ()
    %cst_45 = arith.constant dense<0.000000e+00> : vector<4x4x4xf32>
    %87 = tpu.matmul %80, %83, %cst_45 {dimension_numbers = #tpu.dot_dimension_numbers<[2], [2], [1], [1], [0, 0, 0, 1, 1, 1], [0], [0]>} : vector<4x4x8xbf16>, vector<4x4x8xbf16>, vector<4x4x4xf32> -> vector<4x4x4xf32>
    "tpu.trace_stop"() : () -> ()
    %cst_46 = arith.constant dense<0xFF800000> : vector<4x4xf32>
    %88 = vector.multi_reduction <maximumf>, %87, %cst_46 [2] : vector<4x4x4xf32> to vector<4x4xf32>
    %89 = vector.shape_cast %88 : vector<4x4xf32> to vector<4x4x1xf32>
    %90 = vector.broadcast %89 : vector<4x4x1xf32> to vector<4x4x4xf32>
    %91 = arith.subf %87, %90 : vector<4x4x4xf32>
    %92 = math.exp %91 : vector<4x4x4xf32>
    %cst_47 = arith.constant dense<0.000000e+00> : vector<4x4xf32>
    %93 = vector.multi_reduction <add>, %92, %cst_47 [2] : vector<4x4x4xf32> to vector<4x4xf32>
    %94 = vector.shape_cast %93 : vector<4x4xf32> to vector<4x4x1xf32>
    %95 = tpu.reciprocal %94 {approx = true} : vector<4x4x1xf32> -> vector<4x4x1xf32>
    %96 = arith.truncf %92 : vector<4x4x4xf32> to vector<4x4x4xbf16>
    "tpu.trace_start"() <{level = 10 : i32, message = "hqk,hkd->hqd"}> : () -> ()
    %cst_48 = arith.constant dense<0.000000e+00> : vector<4x4x8xf32>
    %97 = tpu.matmul %96, %86, %cst_48 {dimension_numbers = #tpu.dot_dimension_numbers<[2], [1], [1], [2], [0, 0, 0, 1, 1, 2], [0], [0]>} : vector<4x4x4xbf16>, vector<4x4x8xbf16>, vector<4x4x8xf32> -> vector<4x4x8xf32>
    "tpu.trace_stop"() : () -> ()
    %98 = vector.broadcast %95 : vector<4x4x1xf32> to vector<4x4x8xf32>
    %99 = arith.mulf %97, %98 : vector<4x4x8xf32>
    %100 = tpu.transpose %99, [1, 0, 2] : vector<4x4x8xf32> -> vector<4x4x8xf32>
    %101 = vector.shape_cast %100 : vector<4x4x8xf32> to vector<4x32xf32>
    %102 = arith.truncf %101 : vector<4x32xf32> to vector<4x32xbf16>
    %c1_49 = arith.constant 1 : index
    %c0_50 = arith.constant 0 : index
    %c0_51 = arith.constant 0 : index
    %103 = vector.load %arg6[%c1_49, %c0_50, %c0_51] : memref<2x32x32xbf16, #tpu.memory_space<vmem>>, vector<1x32x32xbf16>
    %104 = vector.shape_cast %103 : vector<1x32x32xbf16> to vector<32x32xbf16>
    %cst_52 = arith.constant dense<0.000000e+00> : vector<4x32xf32>
    %105 = tpu.matmul %102, %104, %cst_52 {dimension_numbers = #tpu.dot_dimension_numbers<[1], [0], [0], [1], [0, 0, 1, 1], [], []>} : vector<4x32xbf16>, vector<32x32xbf16>, vector<4x32xf32> -> vector<4x32xf32>
    %c1_53 = arith.constant 1 : index
    %c0_54 = arith.constant 0 : index
    %c0_55 = arith.constant 0 : index
    %106 = vector.load %arg7[%c1_53, %c0_54, %c0_55] : memref<2x1x32xf32, #tpu.memory_space<vmem>>, vector<1x1x32xf32>
    %107 = vector.shape_cast %106 : vector<1x1x32xf32> to vector<1x32xf32>
    %108 = vector.broadcast %107 : vector<1x32xf32> to vector<4x32xf32>
    %109 = arith.addf %105, %108 : vector<4x32xf32>
    %110 = arith.truncf %109 : vector<4x32xf32> to vector<4x32xbf16>
    %c1_56 = arith.constant 1 : index
    %c0_57 = arith.constant 0 : index
    %c0_58 = arith.constant 0 : index
    %c0_59 = arith.constant 0 : index
    %111 = vector.load %arg8[%c1_56, %c0_57, %c0_58, %c0_59] : memref<2x1x4x32xbf16, #tpu.memory_space<vmem>>, vector<1x1x4x32xbf16>
    %112 = vector.shape_cast %111 : vector<1x1x4x32xbf16> to vector<4x32xbf16>
    %113 = vector.shape_cast %110 : vector<4x32xbf16> to vector<1x1x4x32xbf16>
    tpu.vector_store %arg8[%c1_56, %c0_57, %c0_58, %c0_59], %113 {strides = array<i32>} : memref<2x1x4x32xbf16, #tpu.memory_space<vmem>>, vector<1x1x4x32xbf16>,
    return
  }
  func.func @transform_0(%arg0: i32) -> (i32, i32, i32) {
    %c0_i32 = arith.constant 0 : i32
    %c0_i32_0 = arith.constant 0 : i32
    %c0_i32_1 = arith.constant 0 : i32
    return %arg0, %c0_i32, %c0_i32_0 : i32, i32, i32
  }
  func.func @transform_1(%arg0: i32) -> (i32, i32, i32) {
    %c0_i32 = arith.constant 0 : i32
    %c0_i32_0 = arith.constant 0 : i32
    %c0_i32_1 = arith.constant 0 : i32
    %c0_i32_2 = arith.constant 0 : i32
    return %c0_i32, %c0_i32_0, %c0_i32_1 : i32, i32, i32
  }
  func.func @transform_2(%arg0: i32) -> (i32, i32, i32) {
    %c0_i32 = arith.constant 0 : i32
    %c0_i32_0 = arith.constant 0 : i32
    %c0_i32_1 = arith.constant 0 : i32
    %c0_i32_2 = arith.constant 0 : i32
    return %c0_i32, %c0_i32_0, %c0_i32_1 : i32, i32, i32
  }
  func.func @transform_3(%arg0: i32) -> (i32, i32, i32) {
    %c0_i32 = arith.constant 0 : i32
    %c0_i32_0 = arith.constant 0 : i32
    %c0_i32_1 = arith.constant 0 : i32
    %c0_i32_2 = arith.constant 0 : i32
    return %c0_i32, %c0_i32_0, %c0_i32_1 : i32, i32, i32
  }
  func.func @transform_4(%arg0: i32) -> (i32, i32, i32) {
    %c0_i32 = arith.constant 0 : i32
    %c0_i32_0 = arith.constant 0 : i32
    %c0_i32_1 = arith.constant 0 : i32
    %c0_i32_2 = arith.constant 0 : i32
    return %c0_i32, %c0_i32_0, %c0_i32_1 : i32, i32, i32
  }
  func.func @transform_5(%arg0: i32) -> (i32, i32, i32) {
    %c0_i32 = arith.constant 0 : i32
    %c0_i32_0 = arith.constant 0 : i32
    %c0_i32_1 = arith.constant 0 : i32
    %c0_i32_2 = arith.constant 0 : i32
    return %c0_i32, %c0_i32_0, %c0_i32_1 : i32, i32, i32
  }
  func.func @transform_6(%arg0: i32) -> (i32, i32, i32) {
    %c0_i32 = arith.constant 0 : i32
    %c0_i32_0 = arith.constant 0 : i32
    %c0_i32_1 = arith.constant 0 : i32
    %c0_i32_2 = arith.constant 0 : i32
    return %c0_i32, %c0_i32_0, %c0_i32_1 : i32, i32, i32
  }
  func.func @transform_7(%arg0: i32) -> (i32, i32, i32, i32) {
    %c0_i32 = arith.constant 0 : i32
    %c0_i32_0 = arith.constant 0 : i32
    %c0_i32_1 = arith.constant 0 : i32
    %c0_i32_2 = arith.constant 0 : i32
    return %c0_i32, %arg0, %c0_i32_0, %c0_i32_1 : i32, i32, i32, i32
  }
}

module attributes {stable_mosaic.version = 11 : i64} {
  func.func @_cross_attn_kernel(%arg0: i32, %arg1: i32, %arg2: memref<1x16x32xbf16, #tpu.memory_space<vmem>>, %arg3: memref<32x32xbf16, #tpu.memory_space<vmem>>, %arg4: memref<1x32xf32, #tpu.memory_space<vmem>>, %arg5: memref<2x1x4x32xbf16, #tpu.memory_space<vmem>>, %arg6: memref<32x32xbf16, #tpu.memory_space<vmem>>, %arg7: memref<1x32xf32, #tpu.memory_space<vmem>>, %arg8: memref<1x16x32xf32, #tpu.memory_space<vmem>>) attributes {dimension_semantics = [#tpu.dimension_semantics<parallel>, #tpu.dimension_semantics<parallel>], iteration_bounds = array<i64: 2, 1>, scalar_prefetch = 0 : i64, scratch_operands = 0 : i64, tpu.core_type = #tpu.core_type<tc>, window_params = [{transform_indices = @transform_0, window_bounds = array<i64: 1, 16, 32>}, {pipeline_mode = #tpu.pipeline_mode<synchronous>, transform_indices = @transform_1, window_bounds = array<i64: 32, 32>}, {pipeline_mode = #tpu.pipeline_mode<synchronous>, transform_indices = @transform_2, window_bounds = array<i64: 1, 32>}, {transform_indices = @transform_3, window_bounds = array<i64: 2, 1, 4, 32>}, {pipeline_mode = #tpu.pipeline_mode<synchronous>, transform_indices = @transform_4, window_bounds = array<i64: 32, 32>}, {pipeline_mode = #tpu.pipeline_mode<synchronous>, transform_indices = @transform_5, window_bounds = array<i64: 1, 32>}, {transform_indices = @transform_6, window_bounds = array<i64: 1, 16, 32>}]} {
    %c0 = arith.constant 0 : index
    %c0_0 = arith.constant 0 : index
    %c0_1 = arith.constant 0 : index
    %0 = vector.load %arg2[%c0, %c0_0, %c0_1] : memref<1x16x32xbf16, #tpu.memory_space<vmem>>, vector<1x16x32xbf16>
    %1 = vector.shape_cast %0 : vector<1x16x32xbf16> to vector<16x32xbf16>
    %c0_2 = arith.constant 0 : index
    %c0_3 = arith.constant 0 : index
    %2 = vector.load %arg3[%c0_2, %c0_3] : memref<32x32xbf16, #tpu.memory_space<vmem>>, vector<32x32xbf16>
    %cst = arith.constant dense<0.000000e+00> : vector<16x32xf32>
    %3 = tpu.matmul %1, %2, %cst {dimension_numbers = #tpu.dot_dimension_numbers<[1], [0], [0], [1], [0, 0, 1, 1], [], []>} : vector<16x32xbf16>, vector<32x32xbf16>, vector<16x32xf32> -> vector<16x32xf32>
    %c0_4 = arith.constant 0 : index
    %c0_5 = arith.constant 0 : index
    %4 = vector.load %arg4[%c0_4, %c0_5] : memref<1x32xf32, #tpu.memory_space<vmem>>, vector<1x32xf32>
    %5 = vector.broadcast %4 : vector<1x32xf32> to vector<16x32xf32>
    %6 = arith.addf %3, %5 : vector<16x32xf32>
    %c0_6 = arith.constant 0 : index
    %c0_7 = arith.constant 0 : index
    %c0_8 = arith.constant 0 : index
    %c0_9 = arith.constant 0 : index
    %7 = vector.load %arg5[%c0_6, %c0_7, %c0_8, %c0_9] : memref<2x1x4x32xbf16, #tpu.memory_space<vmem>>, vector<1x1x4x32xbf16>
    %8 = vector.shape_cast %7 : vector<1x1x4x32xbf16> to vector<4x32xbf16>
    %c1 = arith.constant 1 : index
    %c0_10 = arith.constant 0 : index
    %c0_11 = arith.constant 0 : index
    %c0_12 = arith.constant 0 : index
    %9 = vector.load %arg5[%c1, %c0_10, %c0_11, %c0_12] : memref<2x1x4x32xbf16, #tpu.memory_space<vmem>>, vector<1x1x4x32xbf16>
    %10 = vector.shape_cast %9 : vector<1x1x4x32xbf16> to vector<4x32xbf16>
    %cst_13 = arith.constant 0.353553385 : f32
    %11 = vector.broadcast %cst_13 : f32 to vector<16x32xf32>
    %12 = arith.mulf %6, %11 : vector<16x32xf32>
    %13 = arith.truncf %12 : vector<16x32xf32> to vector<16x32xbf16>
    %14 = vector.shape_cast %13 : vector<16x32xbf16> to vector<16x4x8xbf16>
    %15 = tpu.transpose %14, [1, 0, 2] : vector<16x4x8xbf16> -> vector<4x16x8xbf16>
    %16 = vector.shape_cast %8 : vector<4x32xbf16> to vector<4x4x8xbf16>
    %17 = tpu.transpose %16, [1, 0, 2] : vector<4x4x8xbf16> -> vector<4x4x8xbf16>
    %18 = vector.shape_cast %10 : vector<4x32xbf16> to vector<4x4x8xbf16>
    %19 = tpu.transpose %18, [1, 0, 2] : vector<4x4x8xbf16> -> vector<4x4x8xbf16>
    "tpu.trace_start"() <{level = 10 : i32, message = "hqd,hkd->hqk"}> : () -> ()
    %cst_14 = arith.constant dense<0.000000e+00> : vector<4x16x4xf32>
    %20 = tpu.matmul %15, %17, %cst_14 {dimension_numbers = #tpu.dot_dimension_numbers<[2], [2], [1], [1], [0, 0, 0, 1, 1, 1], [0], [0]>} : vector<4x16x8xbf16>, vector<4x4x8xbf16>, vector<4x16x4xf32> -> vector<4x16x4xf32>
    "tpu.trace_stop"() : () -> ()
    %cst_15 = arith.constant dense<0xFF800000> : vector<4x16xf32>
    %21 = vector.multi_reduction <maximumf>, %20, %cst_15 [2] : vector<4x16x4xf32> to vector<4x16xf32>
    %22 = vector.shape_cast %21 : vector<4x16xf32> to vector<4x16x1xf32>
    %23 = vector.broadcast %22 : vector<4x16x1xf32> to vector<4x16x4xf32>
    %24 = arith.subf %20, %23 : vector<4x16x4xf32>
    %25 = math.exp %24 : vector<4x16x4xf32>
    %cst_16 = arith.constant dense<0.000000e+00> : vector<4x16xf32>
    %26 = vector.multi_reduction <add>, %25, %cst_16 [2] : vector<4x16x4xf32> to vector<4x16xf32>
    %27 = vector.shape_cast %26 : vector<4x16xf32> to vector<4x16x1xf32>
    %28 = tpu.reciprocal %27 {approx = true} : vector<4x16x1xf32> -> vector<4x16x1xf32>
    %29 = arith.truncf %25 : vector<4x16x4xf32> to vector<4x16x4xbf16>
    "tpu.trace_start"() <{level = 10 : i32, message = "hqk,hkd->hqd"}> : () -> ()
    %cst_17 = arith.constant dense<0.000000e+00> : vector<4x16x8xf32>
    %30 = tpu.matmul %29, %19, %cst_17 {dimension_numbers = #tpu.dot_dimension_numbers<[2], [1], [1], [2], [0, 0, 0, 1, 1, 2], [0], [0]>} : vector<4x16x4xbf16>, vector<4x4x8xbf16>, vector<4x16x8xf32> -> vector<4x16x8xf32>
    "tpu.trace_stop"() : () -> ()
    %31 = vector.broadcast %28 : vector<4x16x1xf32> to vector<4x16x8xf32>
    %32 = arith.mulf %30, %31 : vector<4x16x8xf32>
    %33 = tpu.transpose %32, [1, 0, 2] : vector<4x16x8xf32> -> vector<16x4x8xf32>
    %34 = vector.shape_cast %33 : vector<16x4x8xf32> to vector<16x32xf32>
    %35 = arith.truncf %34 : vector<16x32xf32> to vector<16x32xbf16>
    %c0_18 = arith.constant 0 : index
    %c0_19 = arith.constant 0 : index
    %36 = vector.load %arg6[%c0_18, %c0_19] : memref<32x32xbf16, #tpu.memory_space<vmem>>, vector<32x32xbf16>
    %cst_20 = arith.constant dense<0.000000e+00> : vector<16x32xf32>
    %37 = tpu.matmul %35, %36, %cst_20 {dimension_numbers = #tpu.dot_dimension_numbers<[1], [0], [0], [1], [0, 0, 1, 1], [], []>} : vector<16x32xbf16>, vector<32x32xbf16>, vector<16x32xf32> -> vector<16x32xf32>
    %c0_21 = arith.constant 0 : index
    %c0_22 = arith.constant 0 : index
    %38 = vector.load %arg7[%c0_21, %c0_22] : memref<1x32xf32, #tpu.memory_space<vmem>>, vector<1x32xf32>
    %39 = vector.broadcast %38 : vector<1x32xf32> to vector<16x32xf32>
    %40 = arith.addf %37, %39 : vector<16x32xf32>
    %c0_23 = arith.constant 0 : index
    %c0_24 = arith.constant 0 : index
    %c0_25 = arith.constant 0 : index
    %41 = vector.load %arg8[%c0_23, %c0_24, %c0_25] : memref<1x16x32xf32, #tpu.memory_space<vmem>>, vector<1x16x32xf32>
    %42 = vector.shape_cast %41 : vector<1x16x32xf32> to vector<16x32xf32>
    %43 = vector.shape_cast %40 : vector<16x32xf32> to vector<1x16x32xf32>
    tpu.vector_store %arg8[%c0_23, %c0_24, %c0_25], %43 {strides = array<i32>} : memref<1x16x32xf32, #tpu.memory_space<vmem>>, vector<1x16x32xf32>,
    return
  }
  func.func @transform_0(%arg0: i32, %arg1: i32) -> (i32, i32, i32) {
    %c0_i32 = arith.constant 0 : i32
    %c0_i32_0 = arith.constant 0 : i32
    return %arg0, %arg1, %c0_i32 : i32, i32, i32
  }
  func.func @transform_1(%arg0: i32, %arg1: i32) -> (i32, i32) {
    %c0_i32 = arith.constant 0 : i32
    %c0_i32_0 = arith.constant 0 : i32
    %c0_i32_1 = arith.constant 0 : i32
    return %c0_i32, %c0_i32_0 : i32, i32
  }
  func.func @transform_2(%arg0: i32, %arg1: i32) -> (i32, i32) {
    %c0_i32 = arith.constant 0 : i32
    %c0_i32_0 = arith.constant 0 : i32
    %c0_i32_1 = arith.constant 0 : i32
    return %c0_i32, %c0_i32_0 : i32, i32
  }
  func.func @transform_3(%arg0: i32, %arg1: i32) -> (i32, i32, i32, i32) {
    %c0_i32 = arith.constant 0 : i32
    %c0_i32_0 = arith.constant 0 : i32
    %c0_i32_1 = arith.constant 0 : i32
    %c0_i32_2 = arith.constant 0 : i32
    return %c0_i32, %arg0, %c0_i32_0, %c0_i32_1 : i32, i32, i32, i32
  }
  func.func @transform_4(%arg0: i32, %arg1: i32) -> (i32, i32) {
    %c0_i32 = arith.constant 0 : i32
    %c0_i32_0 = arith.constant 0 : i32
    %c0_i32_1 = arith.constant 0 : i32
    return %c0_i32, %c0_i32_0 : i32, i32
  }
  func.func @transform_5(%arg0: i32, %arg1: i32) -> (i32, i32) {
    %c0_i32 = arith.constant 0 : i32
    %c0_i32_0 = arith.constant 0 : i32
    %c0_i32_1 = arith.constant 0 : i32
    return %c0_i32, %c0_i32_0 : i32, i32
  }
  func.func @transform_6(%arg0: i32, %arg1: i32) -> (i32, i32, i32) {
    %c0_i32 = arith.constant 0 : i32
    %c0_i32_0 = arith.constant 0 : i32
    return %arg0, %arg1, %c0_i32 : i32, i32, i32
  }
}

</mosaic_0001>

<bundles_post_ra>
// kernel: k_attention_forward.3
= control target key start
LH: loop header
LB: loop body
LE: loop exit
PB: predicated region body
PF: predicated region fallthrough
CT: control target
= control target key end

     0   :  { %11 = vsyncpa [#allocation4], 0  ;;  %s2150_s0 = inlined_call_operand.vmem [shape: bf16[2,16,32], index: 0, kind: input, shape index: {}]   ;;  %s2151_s1 = inlined_call_operand.vmem [shape: bf16[32,32], index: 1, kind: input, shape index: {}]   ;;  %s2152_s2 = inlined_call_operand.vmem [shape: f32[1,32], index: 2, kind: input, shape index: {}]   ;;  %s2153_s3 = inlined_call_operand.vmem [shape: bf16[2,2,4,32], index: 3, kind: input, shape index: {}]   ;;  %s2154_s4 = inlined_call_operand.vmem [shape: bf16[32,32], index: 4, kind: input, shape index: {}]   ;;  %s2155_s5 = inlined_call_operand.vmem [shape: f32[1,32], index: 5, kind: input, shape index: {}]   ;;  %s2156_s6 = inlined_call_operand.hbm [shape: f32[2,16,32], index: 6, kind: output, shape index: {}]  }
   0x1   :  { %13 = vsyncpa [#allocation4 + $0x1], 0  ;;  %s1766_s21 = smov 0   ;;  %s1768_s22 = smov 0  }
   0x2   :  { %s1770_s23 = smov 0   ;;  %s1772_s24 = smov 0  }
   0x3   :  { %s1774_s25 = smov 0   ;;  %s1776_s26 = smov 0  }
   0x4 LB: > { %s1475_s27 = sadd.s32 4294967295, %s1720_s26   ;;  %s1476_s28 = sadd.s32 4294967294, %s1720_s26   ;;  %s1720_s26 = sphi %s1776_s26, %s19_s26   ;;  %s1716_s25 = sphi %s1774_s25, %s2163_s25   ;;  %s1712_s24 = sphi %s1772_s24, %s2162_s24   ;;  %s1708_s23 = sphi %s1770_s23, %s2161_s23   ;;  %s1704_s22 = sphi %s1768_s22, %s2160_s22   ;;  %s1700_s21 = sphi %s1766_s21, %s2159_s21  }
   0x5   : > { %s31_s29 = sadd.s32 1, %s1716_s25  ;;  %s108_s30 = sadd.s32 1, %s1708_s23 }
   0x6   : > { %p33_p0 = scmp.ge.s32.totalorder %s31_s29, 2  ;;  %p115_p1 = scmp.ne.s32.totalorder %s1708_s23, %s1704_s22 }
   0x7   : > { %p116_p2 = scmp.eq.s32.totalorder %s1720_s26, 0  ;;  %p189_p3 = scmp.eq.s32.totalorder %s1475_s27, 1 }
   0x8   : > { %s2165_s29 = smov (%p33_p0, %s31_s29), 0  ;;  %p194_p6 = scmp.ne.s32.totalorder %s1704_s22, %s1700_s21 }
   0x9   : > { %p117_p4 = por %p116_p2, %p115_p1  ;;  %p1805_p5 = por %p189_p3, %p115_p1 }
   0xa   : > { %s105_s8 = ssub.s32 %s1716_s25, %s2165_s29  ;;  %p195_p8 = scmp.eq.s32.totalorder %s1476_s28, 1 }
   0xb   : > { %p106_p7 = scmp.eq.s32.totalorder %s105_s8, 0  ;;  %p1478_p10 = scmp.ge.s32.totalorder %s1720_s26, 2 }
   0xc   : > { %p1816_p9 = por %p195_p8, %p194_p6 }
   0xd   : > { %s1814_s9 = scalar_select %p106_p7, %s1708_s23, %s108_s30  }
   0xe   : > { %223 = sbr.rel (%p1478_p10) target bundleno = 25 (0x19), region = 32 }
  0x13   : > { %239 = sbr.rel (!%p117_p4) target bundleno = 25 (0x19), region = 40  ;;  %s241_s11 = sand.u32 (%p117_p4), 1, %s1708_s23  }
  0x14   : > { %s1480_s12 = sshll.u32 (%p117_p4), %s1716_s25, 1  ;;  %s1479_s13 = sshll.u32 (%p117_p4), %s241_s11, 2 }
  0x15   : > { %s245_s16 = scalar_lea.vmem (%p117_p4), %s2153_s3, %s1480_s12  ;;  %s243_s17 = scalar_lea.vmem (%p117_p4), [#allocation2], %s1479_s13 }
  0x16   : > { %v262_v0 = vld [vmem:[%s245_s16] sm:$0x3] (%p117_p4)  ;;  %v264_v1 = vld [vmem:[%s245_s16 + $0x4] sm:$0x3] (%p117_p4) }
  0x17   : > { %263 = vst [vmem:[%s243_s17] sm:$0x3] (%p117_p4), %v262_v0 }
  0x18   : > { %265 = vst [vmem:[%s243_s17 + $0x2] sm:$0x3] %v264_v1 }
  0x19 PF: > { %p1481_p11 = scmp.ge.s32.totalorder %s1720_s26, 1  ;;  %p284_p12 = scmp.lt.s32.totalorder %s1720_s26, 3 }
  0x1b   : > { %p285_p13 = pnand %p1481_p11, %p284_p12 }
  0x1c   : > { %p330_p0 = scmp.lt.s32.totalorder (!%p285_p13), %s1712_s24, 1  ;;  %s1722_s15 = smov (!%p285_p13), 104  }
  0x1d   : > { %288 = sbr.rel (%p285_p13) target bundleno = 1048 (0x418), region = 74  ;;  %s1723_s16 = smov (!%p285_p13), 112  }
  0x1e   : > { %s1724_s17 = smov (!%p285_p13), 120   ;;  %s1849_s18 = sand.u32 (!%p285_p13), 1, %s1704_s22  }
  0x1f   : > { %s1482_s19 = sshll.u32 (!%p285_p13), %s1849_s18, 2  ;;  %s1727_s27 = smov (!%p285_p13), 24  }
  0x20   : > { %s1860_s20 = scalar_lea.vmem (!%p285_p13), [#allocation2], %s1482_s19  ;;  %s1483_s14 = sshll.u32 (!%p285_p13), %s1849_s18, 4 }
  0x21   : > { %s328_s19 = scalar_lea.vmem (!%p285_p13), [#allocation3], %s1483_s14 }
  0x22   : > { %v1525_v2 = vld [vmem:[%s2151_s1 + $0x8] sm:$0xff]  ;;  %v1524_v3 = vld [vmem:[%s2151_s1] sm:$0xff]  ;;  %s331_s28 = scalar_select %p330_p0, %s1712_s24, 1  ;;  %vm368_vm0 = vcmask 261120   ;;  %v1725_v16 = vmov 1983009808  }
  0x23   : > { %378 = vmatpush.bf16.msra.mxu0 %v1525_v2  ;;  %v1608_v5 = vld [vmem:[%s2152_s2] ss:$0 sm:$0xff]  ;;  %v433_v17 = vunpack.c.l.s4 %v1725_v16  ;;  %v1726_v20 = vmov 1934713408   ;;  %vm442_vm1 = vcmask 1047556   ;;  %vm779_vm2 = vcmask 64512  }
  0x24   : > { %s1522_s30 = sshll.u32 %s331_s28, 3  ;;  %v1863_v14 = vld [vmem:[%s1860_s20] sm:$0x3]  ;;  %v447_v21 = vunpack.c.l.s4 %v1726_v20  ;;  %vm869_vm3 = vcmask 31744   ;;  %vm966_vm4 = vcmask 1041408   ;;  %s1728_s28 = smov 16  }
  0x25   : > { %s337_s12 = scalar_lea.vmem %s2150_s0, %s1522_s30  ;;  %v1871_v18 = vunpack.c.0.s8 %v433_v17  ;;  %s1729_s30 = smov 8   ;;  %vm1314_vm5 = vcmask 130048   ;;  %vm1317_vm6 = vcmask 195584  }
  0x26   : > { %v1523_v4 = vld [vmem:[%s337_s12] sm:$0xff]  ;;  %v1874_v31 = vunpack.c.0.s8 %v447_v21  ;;  %s1375_s8 = sshll.u32 %s328_s19, 4  ;;  %s1361_s12 = scalar_lea.sflag [#allocation4], %s1849_s18  ;;  %s1376_s8 = int_to_ptr.vmem [resolvable:$true] %s1375_s8 }
  0x27   : > { %379 = vmatpush.bf16.msra.mxu0 %v1524_v3 }
  0x2a   : > { %1498 = vmatmul.msk.bf16.vlgmr.msra.gmra.mxu0 %vm368_vm0, %v1523_v4 }
  0xa7   : > { %v381_v6 = vpop.f32.mrf.mxu0 }
  0xa8   : > { %v382_v7 = vadd.f32 %v1608_v5, %v381_v6 }
  0xaa   : > { %v389_v8 = vmul.f32 0.35355338, %v382_v7 }
  0xac   : > { %v391_v9 = vpack.c.bf16 %v389_v8, %v389_v8 }
  0xae   : > { %403 = vrot.lane.b32.xlu2 %v391_v9, %s1722_s15  ;;  %399 = vrot.lane.b32.xlu1 %v391_v9, %s1723_s16  ;;  %v410_v27 = vshrl.u32 %v391_v9, 16 }
  0xaf   : > { %395 = vrot.lane.b32.xlu0 %v391_v9, %s1724_s17  ;;  %v383_v10 = vpop.f32.mrf.mxu0 }
  0xb0   : > { %v384_v11 = vadd.f32 %v1608_v5, %v383_v10 }
  0xb2   : > { %v390_v12 = vmul.f32 0.35355338, %v384_v11 }
  0xb4   : > { %v1851_v13 = vpack.c.bf16 %v390_v12, %v390_v12 }
  0xb6   : > { %405 = vrot.lane.b32.xlu2 %v1851_v13, %s1722_s15  ;;  %401 = vrot.lane.b32.xlu1 %v1851_v13, %s1723_s16  ;;  %v422_v1 = vshrl.u32 %v1851_v13, 16 }
  0xb7   : > { %397 = vrot.lane.b32.xlu0 %v1851_v13, %s1724_s17 }
  0xbe   : > { %643 = vrot.lane.b32.xlu1 %v1863_v14, %s1722_s15  ;;  %637 = vrot.lane.b32.xlu2 %v1863_v14, %s1724_s17 }
  0xbf   : > { %640 = vrot.lane.b32.xlu0 %v1863_v14, %s1723_s16 }
 0x108   : > { %v404_v15 = vpop.permute.xlu2 %403 }
 0x109   : > { %v417_v22 = vshrl.u32 %v404_v15, 16 }
 0x110   : > { %v406_v34 = vpop.permute.xlu2 %405 }
 0x111   : > { %v429_v41 = vshrl.u32 %v406_v34, 16 }
 0x118   : > { %v638_v21 = vpop.permute.xlu2 %637 }
 0x120   : > { %v400_v19 = vpop.permute.xlu1 %399 }
 0x121   : > { %v415_v23 = vpack.i.b16 %v404_v15, %v400_v19  ;;  %v416_v24 = vshrl.u32 %v400_v19, 16  ;;  %v396_v25 = vpop.permute.xlu0 %395 }
 0x122   : > { %v409_v26 = vpack.i.b16 %v396_v25, %v391_v9  ;;  %v411_v28 = vshrl.u32 %v396_v25, 16 }
 0x123   : > { %v418_v29 = vpack.i.b16 %v417_v22, %v416_v24  ;;  %v440_v30 = vperm.slane %v415_v23, %v1871_v18 }
 0x124   : > { %v412_v32 = vpack.i.b16 %v411_v28, %v410_v27  ;;  %v435_v33 = vperm.slane %v409_v26, %v1871_v18 }
 0x125   : > { %v441_v35 = vrot.slane %v440_v30, 4  ;;  %v467_v36 = vperm.slane %v418_v29, %v1871_v18 }
 0x126   : > { %v444_v37 = vrot.slane %v435_v33, 4  ;;  %v462_v38 = vperm.slane %v412_v32, %v1871_v18 }
 0x127   : > { %v468_v39 = vrot.slane %v467_v36, 4  ;;  %v443_v40 = vsel %vm442_vm1, %v441_v35, %v435_v33 }
 0x128   : > { %v445_v42 = vsel %vm442_vm1, %v440_v30, %v444_v37  ;;  %v449_v43 = vperm.slane %v443_v40, %v1874_v31  ;;  %v470_v44 = vrot.slane %v462_v38, 4  ;;  %v402_v45 = vpop.permute.xlu1 %401 }
 0x129   : > { %v453_v46 = vperm.slane %v445_v42, %v1874_v31  ;;  %v469_v47 = vsel %vm442_vm1, %v468_v39, %v462_v38  ;;  %v427_v48 = vpack.i.b16 %v406_v34, %v402_v45  ;;  %v428_v49 = vshrl.u32 %v402_v45, 16  ;;  %v398_v50 = vpop.permute.xlu0 %397  ;;  %v1916_v39 = vld [vmem:[%s1860_s20 + $0x2] sm:$0x3] }
 0x12a   : > { %v454_v51 = vrot.slane %v449_v43, 4  ;;  %v471_v52 = vsel %vm442_vm1, %v467_v36, %v470_v44  ;;  %v475_v53 = vperm.slane %v469_v47, %v1874_v31  ;;  %v421_v54 = vpack.i.b16 %v398_v50, %v1851_v13  ;;  %713 = vrot.lane.b32.xlu1 %v1916_v39, %s1722_s15  ;;  %710 = vrot.lane.b32.xlu0 %v1916_v39, %s1723_s16  ;;  %s1662_s16 = scalar_lea.hbm %s2156_s6, 32 }
 0x12b   : > { %v456_v55 = vrot.slane %v453_v46, 4  ;;  %v479_v56 = vperm.slane %v471_v52, %v1874_v31  ;;  %v430_v57 = vpack.i.b16 %v429_v41, %v428_v49  ;;  %v493_v58 = vperm.slane %v427_v48, %v1871_v18  ;;  %707 = vrot.lane.b32.xlu2 %v1916_v39, %s1724_s17  ;;  %s1528_s17 = sshll.u32 %s1712_s24, 4 }
 0x12c   : > { %v480_v59 = vrot.slane %v475_v53, 4  ;;  %v423_v60 = vshrl.u32 %v398_v50, 16  ;;  %v488_v61 = vperm.slane %v421_v54, %v1871_v18  ;;  %v455_v2 = vsel %vm442_vm1, 0, %v454_v51 }
 0x12d   : > { %v457_v62 = vsel %vm442_vm1, 0, %v456_v55  ;;  %v482_v63 = vrot.slane %v479_v56, 4  ;;  %v494_v0 = vrot.slane %v493_v58, 4  ;;  %v519_v4 = vperm.slane %v430_v57, %v1871_v18 }
 0x12e   : > { %v541_v3 = vrot.slane %v457_v62, 4  ;;  %v536_v6 = vsel %vm442_vm1, %v456_v55, %v449_v43  ;;  %v424_v7 = vpack.i.b16 %v423_v60, %v422_v1  ;;  %v481_v9 = vsel %vm442_vm1, 0, %v480_v59 }
 0x12f   : > { %v483_v5 = vsel %vm442_vm1, 0, %v482_v63  ;;  %v495_v8 = vsel %vm442_vm1, %v494_v0, %v488_v61  ;;  %v520_v11 = vrot.slane %v519_v4, 4  ;;  %v496_v12 = vrot.slane %v488_v61, 4 }
 0x130   : > { %v542_v10 = vsel %vm442_vm1, %v541_v3, %v455_v2  ;;  %v644_v15 = vpop.permute.xlu1 %643  ;;  %v501_v16 = vperm.slane %v495_v8, %v1874_v31  ;;  %v514_v17 = vperm.slane %v424_v7, %v1871_v18  ;;  %v1903_v22 = vsel %vm442_vm1, %v482_v63, %v475_v53 }
 0x131   : > { %v546_v13 = vperm.slane %v542_v10, %v1871_v18  ;;  %v654_v19 = vrot.slane %v644_v15, 4  ;;  %v641_v20 = vpop.permute.xlu0 %640  ;;  %v560_v23 = vrot.slane %v483_v5, 4  ;;  %v497_v24 = vsel %vm442_vm1, %v493_v58, %v496_v12 }
 0x132   : > { %v646_v25 = vrot.slane %v641_v20, 4  ;;  %v505_v26 = vperm.slane %v497_v24, %v1874_v31  ;;  %v506_v27 = vrot.slane %v501_v16, 4  ;;  %v521_v28 = vsel %vm442_vm1, %v520_v11, %v514_v17 }
 0x133   : > { %v522_v29 = vrot.slane %v514_v17, 4  ;;  %v527_v30 = vperm.slane %v521_v28, %v1874_v31  ;;  %v655_v33 = vsel %vm442_vm1, %v654_v19, %v638_v21  ;;  %v547_v34 = vrot.slane %v546_v13, 4 }
 0x134   : > { %v647_v32 = vsel %vm442_vm1, %v646_v25, %v1863_v14  ;;  %v540_v35 = vperm.slane %v536_v6, %v1871_v18  ;;  %v508_v36 = vrot.slane %v505_v26, 4  ;;  %v561_v40 = vsel %vm442_vm1, %v560_v23, %v481_v9 }
 0x135   : > { %v523_v37 = vsel %vm442_vm1, %v519_v4, %v522_v29  ;;  %v651_v38 = vperm.slane %v647_v32, %v1874_v31  ;;  %v532_v42 = vrot.slane %v527_v30, 4  ;;  %v659_v43 = vperm.slane %v655_v33, %v1874_v31 }
 0x136   : > { %v531_v41 = vperm.slane %v523_v37, %v1874_v31  ;;  %v509_v14 = vsel %vm442_vm1, 0, %v508_v36  ;;  %v574_v44 = vsel %vm442_vm1, %v508_v36, %v501_v16  ;;  %v559_v46 = vperm.slane %v1903_v22, %v1871_v18 }
 0x137   : > { %v652_v45 = vrot.slane %v651_v38, 4  ;;  %v507_v47 = vsel %vm442_vm1, 0, %v506_v27  ;;  %v579_v49 = vrot.slane %v509_v14, 4  ;;  %v548_v50 = vsel %vm442_vm1, %v547_v34, %v540_v35 }
 0x138   : > { %v534_v48 = vrot.slane %v531_v41, 4  ;;  %v533_v51 = vsel %vm442_vm1, 0, %v532_v42  ;;  %v666_v52 = vshrl.u32 %v651_v38, 16  ;;  %v660_v54 = vrot.slane %v659_v43, 4 }
 0x139   : > { %v653_v53 = vsel %vm442_vm1, 0, %v652_v45  ;;  %v578_v56 = vperm.slane %v574_v44, %v1871_v18  ;;  %v580_v57 = vsel %vm442_vm1, %v579_v49, %v507_v47  ;;  %v667_v62 = vshrl.u32 %v659_v43, 16 }
 0x13a   : > { %v535_v55 = vsel %vm442_vm1, 0, %v534_v48  ;;  %v674_v58 = vshrl.u32 %v653_v53, 16  ;;  %v584_v59 = vperm.slane %v580_v57, %v1871_v18  ;;  %v661_v61 = vsel %vm442_vm1, 0, %v660_v54 }
 0x13b   : > { %v598_v60 = vrot.slane %v535_v55, 4  ;;  %v672_v63 = vpack.i.b16 %v661_v61, %v653_v53  ;;  %v675_v0 = vshrl.u32 %v661_v61, 16  ;;  %v552_v1 = vperm.slane %v548_v50, %v1874_v31 }
 0x13c   : > { %v565_v2 = vperm.slane %v561_v40, %v1871_v18  ;;  %v593_v3 = vsel %vm442_vm1, %v534_v48, %v527_v30  ;;  %v664_v5 = vpack.i.b16 %v659_v43, %v651_v38  ;;  %v585_v6 = vrot.slane %v584_v59, 4 }
 0x13d   : > { %v599_v4 = vsel %vm442_vm1, %v598_v60, %v533_v51  ;;  %v678_v7 = vrot.slane %v672_v63, 4  ;;  %v676_v8 = vpack.i.b16 %v675_v0, %v674_v58  ;;  %v553_v12 = vrot.slane %v552_v1, 4 }
 0x13e   : > { %v566_v9 = vrot.slane %v565_v2, 4  ;;  %v603_v10 = vperm.slane %v599_v4, %v1871_v18  ;;  %v586_v11 = vsel %vm442_vm1, %v585_v6, %v578_v56  ;;  %v668_v15 = vpack.i.b16 %v667_v62, %v666_v52 }
 0x13f   : > { %v679_v13 = vsel %vm442_vm1, %v678_v7, %v664_v5  ;;  %v686_v16 = vrot.slane %v676_v8, 4  ;;  %v597_v21 = vperm.slane %v593_v3, %v1871_v18  ;;  %v590_v24 = vperm.slane %v586_v11, %v1874_v31 }
 0x140   : > { %v567_v17 = vsel %vm442_vm1, %v566_v9, %v559_v46  ;;  %v683_v19 = vperm.slane %v679_v13, %v1874_v31  ;;  %v604_v22 = vrot.slane %v603_v10, 4  ;;  %v615_v25 = vshrl.u32 %v552_v1, 16 }
 0x141   : > { %v571_v20 = vperm.slane %v567_v17, %v1874_v31  ;;  %v687_v23 = vsel %vm442_vm1, %v686_v16, %v668_v15  ;;  %v554_v29 = vsel %vm442_vm1, 0, %v553_v12  ;;  %v627_v42 = vshrl.u32 %v590_v24, 16 }
 0x142   : > { %v691_v26 = vperm.slane %v687_v23, %v1874_v31  ;;  %v684_v27 = vrot.slane %v683_v19, 4  ;;  %v605_v28 = vsel %vm442_vm1, %v604_v22, %v597_v21  ;;  %v697_v30 = vshrl.u32 %v683_v19, 16 }
 0x143   : > { %v609_v32 = vperm.slane %v605_v28, %v1874_v31  ;;  %v616_v33 = vshrl.u32 %v571_v20, 16  ;;  %v572_v34 = vrot.slane %v571_v20, 4  ;;  %v614_v40 = vpack.i.b16 %v571_v20, %v552_v1 }
 0x144   : > { %v696_v35 = vpack.i.b16 %v691_v26, %v683_v19  ;;  %v698_v36 = vshrl.u32 %v691_v26, 16  ;;  %v685_v37 = vsel %vm442_vm1, 0, %v684_v27  ;;  %v692_v38 = vrot.slane %v691_v26, 4 }
 0x145   : > { %v626_v41 = vpack.i.b16 %v609_v32, %v590_v24  ;;  %v591_v43 = vrot.slane %v590_v24, 4  ;;  %v628_v46 = vshrl.u32 %v609_v32, 16  ;;  %v703_v48 = vshrl.u32 %v685_v37, 16 }
 0x146   : > { %v784_v14 = vsel %vm779_vm2, %v696_v35, 0  ;;  %v699_v44 = vpack.i.b16 %v698_v36, %v697_v30  ;;  %v693_v45 = vsel %vm442_vm1, 0, %v692_v38  ;;  %v617_v50 = vpack.i.b16 %v616_v33, %v615_v25 }
 0x147   : > { %793 = vmatpush.bf16.xpose.msra.mxu1 %v784_v14  ;;  %v702_v47 = vpack.i.b16 %v693_v45, %v685_v37  ;;  %v704_v49 = vshrl.u32 %v693_v45, 16  ;;  %v777_v52 = vunpack.c.l.b16 %v626_v41  ;;  %v629_v53 = vpack.i.b16 %v628_v46, %v627_v42 }
 0x148   : > { %v807_v51 = vsel %vm779_vm2, %v699_v44, 0  ;;  %v573_v54 = vsel %vm442_vm1, 0, %v572_v34  ;;  %v592_v57 = vsel %vm442_vm1, 0, %v591_v43  ;;  %v610_v58 = vrot.slane %v609_v32, 4 }
 0x149   : > { %816 = vmatpush.bf16.xpose.msra.mxu2 %v807_v51  ;;  %v830_v55 = vsel %vm779_vm2, %v702_v47, 0  ;;  %v705_v56 = vpack.i.b16 %v704_v49, %v703_v48  ;;  %v776_v59 = vunpack.c.l.b16 %v614_v40  ;;  %v801_v60 = vunpack.c.l.b16 %v629_v53 }
 0x14a   : > { %839 = vmatpush.bf16.xpose.msra.mxu3 %v830_v55  ;;  %v620_v61 = vpack.i.b16 %v573_v54, %v554_v29  ;;  %v622_v62 = vshrl.u32 %v573_v54, 16  ;;  %v800_v0 = vunpack.c.l.b16 %v617_v50  ;;  %v611_v1 = vsel %vm442_vm1, 0, %v610_v58 }
 0x14b   : > { %v853_v63 = vsel %vm779_vm2, %v705_v56, 0  ;;  %v621_v2 = vshrl.u32 %v554_v29, 16  ;;  %v778_v3 = vpack.c.b16 %v777_v52, %v776_v59  ;;  %v632_v4 = vpack.i.b16 %v611_v1, %v592_v57 }
 0x14c   : > { %862 = vmatpush.bf16.xpose.msrb.mxu0 %v853_v63  ;;  %v633_v5 = vshrl.u32 %v592_v57, 16  ;;  %v634_v6 = vshrl.u32 %v611_v1, 16  ;;  %v802_v8 = vpack.c.b16 %v801_v60, %v800_v0  ;;  %v823_v9 = vunpack.c.l.b16 %v620_v61 }
 0x14d   : > { %v623_v7 = vpack.i.b16 %v622_v62, %v621_v2  ;;  %v824_v10 = vunpack.c.l.b16 %v632_v4 }
 0x14e   : > { %1500 = vmatmul.msk.bf16.vlgmr.msra.gmra.mxu1 %vm779_vm2, %v778_v3  ;;  %v635_v11 = vpack.i.b16 %v634_v6, %v633_v5 }
 0x14f   : > { %v825_v12 = vpack.c.b16 %v824_v10, %v823_v9  ;;  %v846_v15 = vunpack.c.l.b16 %v623_v7 }
 0x150   : > { %1501 = vmatmul.msk.bf16.vlgmr.msra.gmra.mxu2 %vm779_vm2, %v802_v8  ;;  %v847_v13 = vunpack.c.l.b16 %v635_v11 }
 0x151   : > { %1502 = vmatmul.msk.bf16.vlgmr.msra.gmra.mxu3 %vm779_vm2, %v825_v12 }
 0x152   : > { %v848_v16 = vpack.c.b16 %v847_v13, %v846_v15 }
 0x154   : > { %1503 = vmatmul.msk.bf16.vlgmr.msrb.gmra.mxu0 %vm779_vm2, %v848_v16 }
 0x185   : > { %v708_v22 = vpop.permute.xlu2 %707 }
 0x19c   : > { %v714_v17 = vpop.permute.xlu1 %713  ;;  %v711_v19 = vpop.permute.xlu0 %710 }
 0x19d   : > { %v724_v20 = vrot.slane %v714_v17, 4  ;;  %v716_v21 = vrot.slane %v711_v19, 4 }
 0x19f   : > { %v717_v23 = vsel %vm442_vm1, %v716_v21, %v1916_v39  ;;  %v725_v24 = vsel %vm442_vm1, %v724_v20, %v708_v22 }
 0x1a0   : > { %v721_v26 = vperm.slane %v717_v23, %v1874_v31  ;;  %v729_v27 = vperm.slane %v725_v24, %v1874_v31 }
 0x1a2   : > { %v722_v29 = vrot.slane %v721_v26, 4  ;;  %v730_v30 = vrot.slane %v729_v27, 4  ;;  %v736_v32 = vshrl.u32 %v721_v26, 16  ;;  %v737_v33 = vshrl.u32 %v729_v27, 16 }
 0x1a3   : > { %v734_v35 = vpack.i.b16 %v729_v27, %v721_v26 }
 0x1a4   : > { %v723_v34 = vsel %vm442_vm1, 0, %v722_v29  ;;  %v731_v39 = vsel %vm442_vm1, 0, %v730_v30  ;;  %v738_v41 = vpack.i.b16 %v737_v33, %v736_v32 }
 0x1a5   : > { %v742_v36 = vpack.i.b16 %v731_v39, %v723_v34  ;;  %v744_v37 = vshrl.u32 %v723_v34, 16  ;;  %v745_v38 = vshrl.u32 %v731_v39, 16 }
 0x1a7   : > { %v746_v42 = vpack.i.b16 %v745_v38, %v744_v37  ;;  %v748_v43 = vrot.slane %v742_v36, 4 }
 0x1a9   : > { %v749_v45 = vsel %vm442_vm1, %v748_v43, %v734_v35  ;;  %v756_v46 = vrot.slane %v746_v42, 4 }
 0x1aa   : > { %v753_v48 = vperm.slane %v749_v45, %v1874_v31 }
 0x1ab   : > { %v757_v50 = vsel %vm442_vm1, %v756_v46, %v738_v41 }
 0x1ac   : > { %v761_v51 = vperm.slane %v757_v50, %v1874_v31  ;;  %v767_v52 = vshrl.u32 %v753_v48, 16  ;;  %v754_v53 = vrot.slane %v753_v48, 4 }
 0x1ae   : > { %v766_v54 = vpack.i.b16 %v761_v51, %v753_v48  ;;  %v768_v55 = vshrl.u32 %v761_v51, 16  ;;  %v755_v56 = vsel %vm442_vm1, 0, %v754_v53  ;;  %v762_v57 = vrot.slane %v761_v51, 4 }
 0x1af   : > { %v773_v58 = vshrl.u32 %v755_v56, 16 }
 0x1b0   : > { %v968_v61 = vsel %vm966_vm4, %v766_v54, 0  ;;  %v769_v62 = vpack.i.b16 %v768_v55, %v767_v52  ;;  %v763_v63 = vsel %vm442_vm1, 0, %v762_v57 }
 0x1b1   : > { %977 = vmatpush.bf16.msrb.mxu1 %v968_v61  ;;  %v772_v1 = vpack.i.b16 %v763_v63, %v755_v56  ;;  %v774_v2 = vshrl.u32 %v763_v63, 16 }
 0x1b2   : > { %v993_v4 = vsel %vm966_vm4, %v769_v62, 0 }
 0x1b3   : > { %1002 = vmatpush.bf16.msrb.mxu2 %v993_v4  ;;  %v1018_v7 = vsel %vm966_vm4, %v772_v1, 0  ;;  %v775_v8 = vpack.i.b16 %v774_v2, %v773_v58 }
 0x1b4   : > { %1027 = vmatpush.bf16.msrb.mxu3 %v1018_v7 }
 0x1b5   : > { %v1043_v9 = vsel %vm966_vm4, %v775_v8, 0 }
 0x1b6   : > { %1052 = vmatpush.bf16.msra.mxu0 %v1043_v9 }
 0x1cb   : > { %v1973_v25 = vpop.f32.mrf.mxu1 }
 0x1cc   : > { %v870_v28 = vsel %vm869_vm3, %v1973_v25, -inf }
 0x1cd   : > { %871 = vmax.xlane.f32.xlu0 %v870_v28 }
 0x1d1   : > { %v1981_v40 = vpop.f32.mrf.mxu0 }
 0x1d2   : > { %v888_v11 = vsel %vm869_vm3, %v1981_v40, -inf }
 0x1d3   : > { %v818_v14 = vpop.f32.mrf.mxu2  ;;  %v797_v10 = vpop.f32.mrf.mxu1 }
 0x1d4   : > { %v876_v44 = vsel %vm869_vm3, %v818_v14, -inf  ;;  %v841_v47 = vpop.f32.mrf.mxu3  ;;  %v873_v12 = vsel %vm869_vm3, %v797_v10, -inf }
 0x1d5   : > { %877 = vmax.xlane.f32.xlu2 %v876_v44  ;;  %v882_v49 = vsel %vm869_vm3, %v841_v47, -inf }
 0x1d6   : > { %883 = vmax.xlane.f32.xlu0 %v882_v49 }
 0x1d9   : > { %v866_v59 = vpop.f32.mrf.mxu0 }
 0x1da   : > { %v891_v5 = vsel %vm869_vm3, %v866_v59, -inf }
 0x1db   : > { %v820_v60 = vpop.f32.mrf.mxu2 }
 0x1dc   : > { %v879_v0 = vsel %vm869_vm3, %v820_v60, -inf  ;;  %v843_v3 = vpop.f32.mrf.mxu3 }
 0x1dd   : > { %880 = vmax.xlane.f32.xlu2 %v879_v0  ;;  %v885_v6 = vsel %vm869_vm3, %v843_v3, -inf }
 0x1de   : > { %892 = vmax.xlane.f32.xlu0 %v891_v5  ;;  %886 = vmax.xlane.f32.xlu1 %v885_v6 }
 0x1e5   : > { %889 = vmax.xlane.f32.xlu2 %v888_v11 }
 0x1e6   : > { %874 = vmax.xlane.f32.xlu1 %v873_v12 }
 0x240   : > { %v872_v15 = vpop.xlane.xlu0 %871 }
 0x241   : > { %v894_v13 = vsub.f32 %v1973_v25, %v872_v15 }
 0x243   : > { %v902_v16 = vmul.f32 1.442695, %v894_v13 }
 0x245   : > { %1610 = vpow2.f32 %v902_v16 }
 0x248   : > { %v878_v17 = vpop.xlane.xlu2 %877 }
 0x249   : > { %v896_v19 = vsub.f32 %v818_v14, %v878_v17  ;;  %v884_v20 = vpop.xlane.xlu0 %883 }
 0x24a   : > { %v898_v22 = vsub.f32 %v841_v47, %v884_v20 }
 0x24b   : > { %v1611_v21 = vpop.eup %1610  ;;  %v906_v24 = vmul.f32 1.442695, %v896_v19 }
 0x24c   : > { %v918_v23 = vsel %vm869_vm3, %v1611_v21, 0.0  ;;  %v910_v26 = vmul.f32 1.442695, %v898_v22 }
 0x24d   : > { %919 = vadd.xlane.f32.xlu0 %v918_v23  ;;  %1612 = vpow2.f32 %v906_v24 }
 0x24e   : > { %1614 = vpow2.f32 %v910_v26 }
 0x250   : > { %v881_v27 = vpop.xlane.xlu2 %880 }
 0x251   : > { %v897_v28 = vsub.f32 %v820_v60, %v881_v27  ;;  %v887_v29 = vpop.xlane.xlu1 %886  ;;  %v893_v30 = vpop.xlane.xlu0 %892 }
 0x252   : > { %v899_v25 = vsub.f32 %v843_v3, %v887_v29  ;;  %v901_v33 = vsub.f32 %v866_v59, %v893_v30  ;;  %v950_v59 = vpack.c.bf16 %v1611_v21, %v1611_v21 }
 0x253   : > { %v908_v32 = vmul.f32 1.442695, %v897_v28  ;;  %v1613_v35 = vpop.eup %1612 }
 0x254   : > { %v912_v34 = vmul.f32 1.442695, %v899_v25  ;;  %v916_v39 = vmul.f32 1.442695, %v901_v33  ;;  %v1615_v37 = vpop.eup %1614  ;;  %v952_v41 = vpack.c.bf16 %v1613_v35, %v1613_v35  ;;  %v960_v3 = vunpack.c.l.b16 %v950_v59 }
 0x255   : > { %1616 = vpow2.f32 %v908_v32  ;;  %v954_v45 = vpack.c.bf16 %v1615_v37, %v1615_v37  ;;  %v930_v8 = vsel %vm869_vm3, %v1615_v37, 0.0 }
 0x256   : > { %1618 = vpow2.f32 %v912_v34  ;;  %v986_v50 = vunpack.c.l.b16 %v952_v41 }
 0x257   : > { %1620 = vpow2.f32 %v916_v39  ;;  %v1011_v54 = vunpack.c.l.b16 %v954_v45 }
 0x258   : > { %v890_v36 = vpop.xlane.xlu2 %889 }
 0x259   : > { %v900_v38 = vsub.f32 %v1981_v40, %v890_v36  ;;  %v875_v42 = vpop.xlane.xlu1 %874 }
 0x25a   : > { %v895_v44 = vsub.f32 %v797_v10, %v875_v42  ;;  %v924_v10 = vsel %vm869_vm3, %v1613_v35, 0.0 }
 0x25b   : > { %v1617_v43 = vpop.eup %1616  ;;  %v914_v14 = vmul.f32 1.442695, %v900_v38 }
 0x25c   : > { %v953_v46 = vpack.c.bf16 %v1617_v43, %v1617_v43  ;;  %v1619_v47 = vpop.eup %1618  ;;  %v904_v48 = vmul.f32 1.442695, %v895_v44  ;;  %v927_v9 = vsel %vm869_vm3, %v1617_v43, 0.0 }
 0x25d   : > { %1622 = vpow2.f32 %v914_v14  ;;  %v1621_v49 = vpop.eup %1620  ;;  %v955_v52 = vpack.c.bf16 %v1619_v47, %v1619_v47  ;;  %v933_v7 = vsel %vm869_vm3, %v1619_v47, 0.0 }
 0x25e   : > { %v987_v51 = vunpack.c.l.b16 %v953_v46  ;;  %1624 = vpow2.f32 %v904_v48  ;;  %v939_v53 = vsel %vm869_vm3, %v1621_v49, 0.0  ;;  %v957_v56 = vpack.c.bf16 %v1621_v49, %v1621_v49 }
 0x25f   : > { %v1012_v55 = vunpack.c.l.b16 %v955_v52  ;;  %940 = vadd.xlane.f32.xlu0 %v939_v53 }
 0x260   : > { %v988_v40 = vpack.c.b16 %v987_v51, %v986_v50  ;;  %v1037_v63 = vunpack.c.l.b16 %v957_v56 }
 0x261   : > { %v1013_v57 = vpack.c.b16 %v1012_v55, %v1011_v54 }
 0x262   : > { %1505 = vmatmul.msk.bf16.vlgmr.msrb.gmra.mxu2 %vm869_vm3, %v988_v40 }
 0x263   : > { %v1623_v58 = vpop.eup %1622  ;;  %1506 = vmatmul.msk.bf16.vlgmr.msrb.gmra.mxu3 %vm869_vm3, %v1013_v57 }
 0x264   : > { %v956_v60 = vpack.c.bf16 %v1623_v58, %v1623_v58  ;;  %v936_v61 = vsel %vm869_vm3, %v1623_v58, 0.0  ;;  %v1625_v62 = vpop.eup %1624 }
 0x265   : > { %937 = vadd.xlane.f32.xlu2 %v936_v61  ;;  %v951_v1 = vpack.c.bf16 %v1625_v62, %v1625_v62  ;;  %v921_v2 = vsel %vm869_vm3, %v1625_v62, 0.0 }
 0x266   : > { %v1036_v0 = vunpack.c.l.b16 %v956_v60  ;;  %922 = vadd.xlane.f32.xlu1 %v921_v2 }
 0x267   : > { %v961_v5 = vunpack.c.l.b16 %v951_v1 }
 0x268   : > { %v1038_v4 = vpack.c.b16 %v1037_v63, %v1036_v0 }
 0x269   : > { %v962_v6 = vpack.c.b16 %v961_v5, %v960_v3 }
 0x26a   : > { %1507 = vmatmul.msk.bf16.vlgmr.msra.gmra.mxu0 %vm869_vm3, %v1038_v4 }
 0x26b   : > { %1504 = vmatmul.msk.bf16.vlgmr.msrb.gmra.mxu1 %vm869_vm3, %v962_v6 }
 0x26d   : > { %934 = vadd.xlane.f32.xlu2 %v933_v7 }
 0x26e   : > { %931 = vadd.xlane.f32.xlu1 %v930_v8 }
 0x275   : > { %928 = vadd.xlane.f32.xlu2 %v927_v9 }
 0x276   : > { %925 = vadd.xlane.f32.xlu1 %v924_v10 }
 0x2c0   : > { %v920_v15 = vpop.xlane.xlu0 %919 }
 0x2c1   : > { %1626 = vrcp.f32 %v920_v15 }
 0x2c7   : > { %v1627_v22 = vpop.eup %1626 }
 0x2d2   : > { %v941_v17 = vpop.xlane.xlu0 %940 }
 0x2d8   : > { %v938_v11 = vpop.xlane.xlu2 %937 }
 0x2d9   : > { %v923_v12 = vpop.xlane.xlu1 %922 }
 0x2e0   : > { %v935_v13 = vpop.xlane.xlu2 %934 }
 0x2e1   : > { %v932_v16 = vpop.xlane.xlu1 %931 }
 0x2e2   : > { %1628 = vrcp.f32 %v932_v16 }
 0x2e3   : > { %1630 = vrcp.f32 %v938_v11 }
 0x2e4   : > { %1632 = vrcp.f32 %v941_v17 }
 0x2e5   : > { %v1004_v19 = vpop.f32.mrf.mxu2  ;;  %1634 = vrcp.f32 %v935_v13 }
 0x2e6   : > { %v1029_v20 = vpop.f32.mrf.mxu3 }
 0x2e7   : > { %v1054_v21 = vpop.f32.mrf.mxu0 }
 0x2e8   : > { %v929_v23 = vpop.xlane.xlu2 %928  ;;  %v1629_v24 = vpop.eup %1628 }
 0x2e9   : > { %1636 = vrcp.f32 %v929_v23  ;;  %v979_v26 = vpop.f32.mrf.mxu1  ;;  %v1063_v27 = vmul.f32 %v1629_v24, %v1029_v20  ;;  %v926_v29 = vpop.xlane.xlu1 %925 }
 0x2ea   : > { %v1059_v28 = vmul.f32 %v1627_v22, %v979_v26  ;;  %1638 = vrcp.f32 %v926_v29  ;;  %v1631_v30 = vpop.eup %1630 }
 0x2eb   : > { %1640 = vrcp.f32 %v923_v12  ;;  %v1067_v32 = vrot.slane %v1063_v27, 4  ;;  %v1633_v33 = vpop.eup %1632  ;;  %v1065_v34 = vmul.f32 %v1631_v30, %v1054_v21 }
 0x2ec   : > { %v1070_v25 = vrot.slane %v1059_v28, 4  ;;  %v1635_v39 = vpop.eup %1634 }
 0x2ed   : > { %v1069_v35 = vsel %vm442_vm1, %v1067_v32, %v1059_v28  ;;  %v1006_v37 = vpop.f32.mrf.mxu2  ;;  %v1080_v47 = vrot.slane %v1065_v34, 4 }
 0x2ee   : > { %v1071_v36 = vsel %vm442_vm1, %v1063_v27, %v1070_v25  ;;  %v1075_v41 = vperm.slane %v1069_v35, %v1871_v18  ;;  %v1031_v42 = vpop.f32.mrf.mxu3 }
 0x2ef   : > { %v1637_v38 = vpop.eup %1636  ;;  %v1056_v43 = vpop.f32.mrf.mxu0  ;;  %v1064_v44 = vmul.f32 %v1635_v39, %v1031_v42  ;;  %v1079_v48 = vperm.slane %v1071_v36, %v1871_v18 }
 0x2f0   : > { %v1062_v14 = vmul.f32 %v1637_v38, %v1006_v37  ;;  %v1066_v45 = vmul.f32 %v1633_v33, %v1056_v43  ;;  %v1639_v46 = vpop.eup %1638  ;;  %v1094_v55 = vrot.slane %v1075_v41, 4 }
 0x2f1   : > { %v981_v49 = vpop.f32.mrf.mxu1  ;;  %v1641_v50 = vpop.eup %1640  ;;  %v1061_v51 = vmul.f32 %v1639_v46, %v1004_v19  ;;  %v1124_v53 = vrot.slane %v1064_v44, 4  ;;  %v1106_v0 = vrot.slane %v1079_v48, 4 }
 0x2f2   : > { %v1138_v52 = vrot.slane %v1062_v14, 4  ;;  %v1136_v54 = vrot.slane %v1066_v45, 4  ;;  %v1060_v40 = vmul.f32 %v1641_v50, %v981_v49 }
 0x2f3   : > { %v1081_v56 = vsel %vm442_vm1, %v1080_v47, %v1061_v51  ;;  %v1082_v57 = vrot.slane %v1061_v51, 4 }
 0x2f4   : > { %v1137_v58 = vsel %vm442_vm1, %v1136_v54, %v1062_v14  ;;  %v1139_v59 = vsel %vm442_vm1, %v1066_v45, %v1138_v52  ;;  %v1087_v60 = vperm.slane %v1081_v56, %v1871_v18  ;;  %v1125_v63 = vsel %vm442_vm1, %v1124_v53, %v1060_v40 }
 0x2f5   : > { %v1143_v61 = vperm.slane %v1137_v58, %v1871_v18  ;;  %v1147_v62 = vperm.slane %v1139_v59, %v1871_v18  ;;  %v1083_v1 = vsel %vm442_vm1, %v1065_v34, %v1082_v57  ;;  %v1126_v2 = vrot.slane %v1060_v40, 4 }
 0x2f6   : > { %v1131_v3 = vperm.slane %v1125_v63, %v1871_v18  ;;  %v1091_v4 = vperm.slane %v1083_v1, %v1871_v18  ;;  %v1092_v5 = vrot.slane %v1087_v60, 4  ;;  %v1095_v6 = vsel %vm442_vm1, %v1087_v60, %v1094_v55 }
 0x2f7   : > { %v1148_v7 = vrot.slane %v1143_v61, 4  ;;  %v1103_v8 = vperm.slane %v1095_v6, %v1874_v31  ;;  %v1160_v9 = vrot.slane %v1147_v62, 4  ;;  %v1127_v10 = vsel %vm442_vm1, %v1064_v44, %v1126_v2 }
 0x2f8   : > { %v1150_v11 = vrot.slane %v1131_v3, 4  ;;  %v1093_v12 = vsel %vm442_vm1, %v1092_v5, %v1075_v41  ;;  %v1104_v15 = vrot.slane %v1091_v4, 4  ;;  %v1107_v13 = vsel %vm442_vm1, %v1091_v4, %v1106_v0 }
 0x2f9   : > { %v1135_v16 = vperm.slane %v1127_v10, %v1871_v18  ;;  %v1099_v17 = vperm.slane %v1093_v12, %v1874_v31  ;;  %v1115_v19 = vperm.slane %v1107_v13, %v1874_v31  ;;  %v1118_v20 = vrot.slane %v1103_v8, 4 }
 0x2fa   : > { %v1149_v21 = vsel %vm442_vm1, %v1148_v7, %v1131_v3  ;;  %v1105_v22 = vsel %vm442_vm1, %v1104_v15, %v1079_v48  ;;  %v1151_v23 = vsel %vm442_vm1, %v1143_v61, %v1150_v11 }
 0x2fb   : > { %v1155_v24 = vperm.slane %v1149_v21, %v1874_v31  ;;  %v1161_v26 = vsel %vm442_vm1, %v1160_v9, %v1135_v16  ;;  %v1119_v27 = vsel %vm442_vm1, 0.0, %v1118_v20  ;;  %v1122_v28 = vrot.slane %v1115_v19, 4 }
 0x2fc   : > { %v1159_v29 = vperm.slane %v1151_v23, %v1874_v31  ;;  %v1162_v30 = vrot.slane %v1135_v16, 4  ;;  %v1185_v32 = vrot.slane %v1119_v27, 4  ;;  %v1167_v25 = vperm.slane %v1161_v26, %v1874_v31 }
 0x2fd   : > { %v1172_v33 = vrot.slane %v1155_v24, 4  ;;  %v1111_v34 = vperm.slane %v1105_v22, %v1874_v31  ;;  %v1116_v36 = vrot.slane %v1099_v17, 4  ;;  %v1123_v37 = vsel %vm442_vm1, 0.0, %v1122_v28 }
 0x2fe   : > { %v1163_v39 = vsel %vm442_vm1, %v1147_v62, %v1162_v30  ;;  %v1174_v35 = vrot.slane %v1159_v29, 4  ;;  %v1176_v42 = vrot.slane %v1167_v25, 4  ;;  %v1180_v46 = vsel %vm442_vm1, %v1118_v20, %v1099_v17 }
 0x2ff   : > { %v1171_v38 = vperm.slane %v1163_v39, %v1874_v31  ;;  %v1173_v41 = vsel %vm442_vm1, 0.0, %v1172_v33  ;;  %v1120_v43 = vrot.slane %v1111_v34, 4  ;;  %v1117_v45 = vsel %vm442_vm1, 0.0, %v1116_v36 }
 0x300   : > { %v1175_v14 = vsel %vm442_vm1, 0.0, %v1174_v35  ;;  %v1234_v44 = vsel %vm442_vm1, %v1174_v35, %v1155_v24  ;;  %v1177_v47 = vsel %vm442_vm1, 0.0, %v1176_v42  ;;  %v1184_v52 = vperm.slane %v1180_v46, %v1871_v18 }
 0x301   : > { %v1178_v48 = vrot.slane %v1171_v38, 4  ;;  %v1238_v49 = vperm.slane %v1234_v44, %v1871_v18  ;;  %v1239_v50 = vrot.slane %v1175_v14, 4  ;;  %v1121_v51 = vsel %vm442_vm1, 0.0, %v1120_v43 }
 0x302   : > { %v1186_v53 = vsel %vm442_vm1, %v1185_v32, %v1117_v45  ;;  %v1191_v54 = vsel %vm442_vm1, %v1122_v28, %v1111_v34  ;;  %v1196_v59 = vrot.slane %v1123_v37, 4  ;;  %v1204_v60 = vrot.slane %v1184_v52, 4 }
 0x303   : > { %v1179_v55 = vsel %vm442_vm1, 0.0, %v1178_v48  ;;  %v1240_v40 = vsel %vm442_vm1, %v1239_v50, %v1173_v41  ;;  %v1190_v56 = vperm.slane %v1186_v53, %v1871_v18  ;;  %v1195_v57 = vperm.slane %v1191_v54, %v1871_v18 }
 0x304   : > { %v1250_v58 = vrot.slane %v1179_v55, 4  ;;  %v1244_v61 = vperm.slane %v1240_v40, %v1871_v18  ;;  %v1245_v63 = vsel %vm442_vm1, %v1178_v48, %v1167_v25  ;;  %v1258_v0 = vrot.slane %v1238_v49, 4  ;;  %v1527_v48 = vld [vmem:[%s2154_s4 + $0x8] sm:$0xff] }
 0x305   : > { %v1216_v62 = vrot.slane %v1195_v57, 4  ;;  %v1202_v1 = vrot.slane %v1190_v56, 4  ;;  %v1197_v2 = vsel %vm442_vm1, %v1196_v59, %v1121_v51  ;;  %v1205_v3 = vsel %vm442_vm1, %v1190_v56, %v1204_v60  ;;  %1350 = vmatpush.bf16.msra.mxu1 %v1527_v48 }
 0x306   : > { %v1249_v4 = vperm.slane %v1245_v63, %v1871_v18  ;;  %v1251_v5 = vsel %vm442_vm1, %v1250_v58, %v1177_v47  ;;  %v1201_v6 = vperm.slane %v1197_v2, %v1871_v18  ;;  %v1213_v7 = vperm.slane %v1205_v3, %v1874_v31 }
 0x307   : > { %v1255_v8 = vperm.slane %v1251_v5, %v1871_v18  ;;  %v1259_v9 = vsel %vm442_vm1, %v1244_v61, %v1258_v0  ;;  %v1203_v12 = vsel %vm442_vm1, %v1202_v1, %v1184_v52  ;;  %v1256_v15 = vrot.slane %v1244_v61, 4  ;;  %v1609_v0 = vld [vmem:[%s2155_s5] ss:$0 sm:$0xff] }
 0x308   : > { %v1267_v10 = vperm.slane %v1259_v9, %v1874_v31  ;;  %v1270_v11 = vrot.slane %v1249_v4, 4  ;;  %v1217_v13 = vsel %vm442_vm1, %v1201_v6, %v1216_v62  ;;  %v1232_v16 = vrot.slane %v1213_v7, 4 }
 0x309   : > { %v1209_v17 = vperm.slane %v1203_v12, %v1874_v31  ;;  %v1214_v19 = vrot.slane %v1201_v6, 4  ;;  %v1225_v20 = vperm.slane %v1217_v13, %v1874_v31  ;;  %v1257_v18 = vsel %vm442_vm1, %v1256_v15, %v1238_v49 }
 0x30a   : > { %v1271_v21 = vsel %vm442_vm1, %v1255_v8, %v1270_v11  ;;  %v1286_v22 = vrot.slane %v1267_v10, 4  ;;  %v1263_v26 = vperm.slane %v1257_v18, %v1874_v31  ;;  %v1268_v29 = vrot.slane %v1255_v8, 4 }
 0x30b   : > { %v1279_v23 = vperm.slane %v1271_v21, %v1874_v31  ;;  %v1215_v24 = vsel %vm442_vm1, %v1214_v19, %v1195_v57  ;;  %v1230_v27 = vrot.slane %v1225_v20, 4  ;;  %v1233_v30 = vsel %vm442_vm1, %v1225_v20, %v1232_v16 }
 0x30c   : > { %v1221_v28 = vperm.slane %v1215_v24, %v1874_v31  ;;  %v1228_v39 = vrot.slane %v1209_v17, 4  ;;  %v1282_v35 = vrot.slane %v1263_v26, 4  ;;  %v1269_v38 = vsel %vm442_vm1, %v1268_v29, %v1249_v4 }
 0x30d   : > { %v1287_v32 = vsel %vm442_vm1, %v1279_v23, %v1286_v22  ;;  %v1284_v25 = vrot.slane %v1279_v23, 4  ;;  %v1231_v36 = vsel %vm442_vm1, %v1230_v27, %v1213_v7  ;;  %v1275_v42 = vperm.slane %v1269_v38, %v1874_v31  ;;  %v1526_v31 = vld [vmem:[%s2154_s4] sm:$0xff] }
 0x30e   : > { %v1603_v33 = vpack.i.bf16 %v1287_v32, %v1233_v30  ;;  %v1226_v34 = vrot.slane %v1221_v28, 4  ;;  %v1229_v14 = vsel %vm442_vm1, %v1221_v28, %v1228_v39  ;;  %1351 = vmatpush.bf16.msra.mxu1 %v1526_v31 }
 0x30f   : > { %v1285_v37 = vsel %vm442_vm1, %v1284_v25, %v1267_v10  ;;  %v1280_v44 = vrot.slane %v1275_v42, 4  ;;  %v1283_v45 = vsel %vm442_vm1, %v1275_v42, %v1282_v35 }
 0x310   : > { %1604 = vrot.lane.b32.xlu2 %v1603_v33, %s1727_s27  ;;  %v1598_v41 = vpack.i.bf16 %v1285_v37, %v1231_v36  ;;  %v1227_v43 = vsel %vm442_vm1, %v1226_v34, %v1209_v17  ;;  %v1593_v46 = vpack.i.bf16 %v1283_v45, %v1229_v14 }
 0x311   : > { %v1281_v47 = vsel %vm442_vm1, %v1280_v44, %v1263_v26 }
 0x312   : > { %1599 = vrot.lane.b32.xlu1 %v1598_v41, %s1728_s28  ;;  %1594 = vrot.lane.b32.xlu0 %v1593_v46, %s1729_s30  ;;  %s1374_s28 = scalar_lea.hbm %s2156_s6, %s1528_s17 }
 0x313   : > { %s1377_s11 = sshll.u32 %s1374_s28, 4  ;;  %s1378_s11 = int_to_ptr.hbm [resolvable:$true] %s1377_s11 }
 0x314   : > { %s1656_s13 = sshra.s32 %s1378_s11, 4  ;;  %s1657_s13 = int_to_ptr.hbm [resolvable:$true] %s1656_s13 }
 0x315   : > { %s1658_s24 = scalar_lea.hbm %s1657_s13, 16  ;;  %p1663_p4 = scmp.lt.s32.totalorder %s1657_s13, %s2156_s6 }
 0x316   : > { %p1659_p1 = scmp.ne.s32.totalorder %s1657_s13, %s1658_s24  ;;  %p1664_p6 = scmp.lt.s32.totalorder %s1662_s16, %s1658_s24 }
 0x318   : > { %p1660_p2 = pnand %p1659_p1, %p1805_p5  ;;  %p1665_p7 = por %p1664_p6, %p1663_p4 }
 0x31a   : > { %p1661_p3 = pneg %p1660_p2 }
 0x31c   : > { %p1666_p8 = pnand %p1665_p7, %p1661_p3 }
 0x36a   : > { %v1605_v50 = vpop.permute.xlu2 %1604 }
 0x36b   : > { %v1607_v40 = vunpack.i.h.bf16 %v1605_v50  ;;  %v1606_v56 = vunpack.i.l.bf16 %v1605_v50 }
 0x384   : > { %v1600_v49 = vpop.permute.xlu1 %1599  ;;  %v1595_v53 = vpop.permute.xlu0 %1594 }
 0x385   : > { %v1602_v51 = vunpack.i.h.bf16 %v1600_v49  ;;  %v1601_v52 = vunpack.i.l.bf16 %v1600_v49  ;;  %v1597_v54 = vunpack.i.h.bf16 %v1595_v53  ;;  %v1596_v55 = vunpack.i.l.bf16 %v1595_v53 }
 0x387   : > { %v1312_v57 = vsel %vm779_vm2, %v1227_v43, %v1596_v55  ;;  %v1313_v58 = vsel %vm779_vm2, %v1281_v47, %v1597_v54 }
 0x388   : > { %v1315_v59 = vsel %vm1314_vm5, %v1312_v57, %v1601_v52  ;;  %v1316_v60 = vsel %vm1314_vm5, %v1313_v58, %v1602_v51 }
 0x389   : > { %v1318_v61 = vsel %vm1317_vm6, %v1315_v59, %v1606_v56  ;;  %v1319_v62 = vsel %vm1317_vm6, %v1316_v60, %v1607_v40 }
 0x38a   : > { %v1320_v63 = vpack.c.bf16 %v1319_v62, %v1318_v61 }
 0x38c   : > { %1516 = vmatmul.msk.bf16.vlgmr.msra.gmra.mxu1 %vm368_vm0, %v1320_v63 }
 0x409   : > { %v1353_v1 = vpop.f32.mrf.mxu1 }
 0x40a   : > { %v1354_v2 = vadd.f32 %v1609_v0, %v1353_v1 }
 0x40c   : > { %1358 = vst.msk [vmem:[%s328_s19] sm:$0xff] %vm368_vm0, %v1354_v2 }
 0x411   : > { %v1355_v3 = vpop.f32.mrf.mxu1 }
 0x412   : > { %v1356_v4 = vadd.f32 %v1609_v0, %v1355_v3 }
 0x414   : > { %1359 = vst.msk [vmem:[%s328_s19 + $0x8] sm:$0xff] %vm368_vm0, %v1356_v4 }
 0x415   : > { %1669 = shalt.err (!%p1666_p8)
}
 0x416   : > { %s1730_s18 = smov 128  }
 0x417   : > { %1529 = dma.vmem_to_hbm [thread:$0]  (%p1805_p5), %s1376_s8, 256, %s1378_s11, %s1361_s12, %s1730_s18, %s1730_s18, %s1729_s30  }
 0x418 PF: > { %s1392_s19 = sand.u32 1, %s1700_s21   ;;  %p1532_p11 = pnand %p1478_p10, %p1816_p9 }
 0x419   : > { %s1393_s27 = scalar_lea.sflag [#allocation4], %s1392_s19 }
 0x41a   : > { %p1533_p12 = pneg %p1532_p11 }
 0x41c   : > { %1695 = dma.done.wait (%p1533_p12), %s1393_s27, 256  }
 0x41d   : > { %1697 = vsyncadd (%p1533_p12), %s1393_s27, 4294967040  ;;  %s19_s26 = sadd.s32 1, %s1720_s26   ;;  %s2159_s21 = smov %s1704_s22 }
 0x41e   : > { %p16_p13 = scmp.ge.s32.totalorder %s19_s26, 4   ;;  %s2160_s22 = smov %s1708_s23 }
 0x41f   : > { %s2161_s23 = smov %s1814_s9  ;;  %s2162_s24 = smov %s1716_s25 }
 0x420   : > { %s2163_s25 = smov %s2165_s29  ;;  %18 = sbr.rel (!%p16_p13) target bundleno = 4 (0x4), region = 122 }
 0x425   :  { %1399 = vsyncpa [#allocation4], 1 }
 0x426   :  { %1401 = vsyncpa [#allocation4 + $0x1], 1 }

// kernel: k_attention_forward.2
= control target key start
LH: loop header
LB: loop body
LE: loop exit
PB: predicated region body
PF: predicated region fallthrough
CT: control target
= control target key end

     0   :  { %s1849_s24 = smov 0   ;;  %s1851_s25 = smov 0   ;;  %s2180_s0 = inlined_call_operand.vmem [shape: bf16[2,4,32], index: 0, kind: input, shape index: {}]   ;;  %s2181_s1 = inlined_call_operand.vmem [shape: bf16[2,32,32], index: 1, kind: input, shape index: {}]   ;;  %s2182_s2 = inlined_call_operand.vmem [shape: f32[2,1,32], index: 2, kind: input, shape index: {}]   ;;  %s2183_s3 = inlined_call_operand.vmem [shape: bf16[2,32,96], index: 3, kind: input, shape index: {}]   ;;  %s2184_s4 = inlined_call_operand.vmem [shape: f32[2,1,96], index: 4, kind: input, shape index: {}]   ;;  %s2185_s5 = inlined_call_operand.vmem [shape: bf16[2,32,32], index: 5, kind: input, shape index: {}]   ;;  %s2186_s6 = inlined_call_operand.vmem [shape: f32[2,1,32], index: 6, kind: input, shape index: {}]   ;;  %s2187_s7 = inlined_call_operand.vmem [shape: bf16[2,2,4,32], index: 7, kind: output, shape index: {}]  }
   0x1   :  { %s1853_s26 = smov 0  }
   0x2 LB: > { %s1862_s27 = sadd.s32 4294967295, %s1797_s26   ;;  %s1864_s28 = sadd.s32 1, %s1797_s26   ;;  %s1797_s26 = sphi %s1853_s26, %s2191_s26   ;;  %s1793_s25 = sphi %s1851_s25, %s2190_s25   ;;  %s1789_s24 = sphi %s1849_s24, %s2189_s24  }
   0x3   : > { %s173_s29 = ssub.s32 %s1797_s26, %s1864_s28  ;;  %s176_s30 = sadd.s32 1, %s1793_s25 }
   0x4   : > { %p174_p0 = scmp.eq.s32.totalorder %s173_s29, 0  ;;  %p186_p1 = scmp.ne.s32.totalorder %s1793_s25, %s1789_s24 }
   0x5   : > { %p187_p2 = scmp.eq.s32.totalorder %s1862_s27, 1  ;;  %p1598_p3 = scmp.ge.s32.totalorder %s1797_s26, 1 }
   0x6   : > { %s1872_s8 = scalar_select %p174_p0, %s1793_s25, %s176_s30  }
   0x7   : > { %p1874_p4 = por %p187_p2, %p186_p1  ;;  %p236_p5 = scmp.lt.s32.totalorder %s1797_s26, 3 }
   0x9   : > { %p237_p6 = pnand %p1598_p3, %p236_p5 }
   0xa   : > { %p266_p7 = scmp.lt.s32.totalorder (!%p237_p6), %s1862_s27, 1  ;;  %s1799_s10 = smov (!%p237_p6), 96  }
   0xb   : > { %240 = sbr.rel (%p237_p6) target bundleno = 2032 (0x7f0), region = 48  ;;  %s1800_s11 = smov (!%p237_p6), 120  }
   0xc   : > { %s1801_s12 = smov (!%p237_p6), 112   ;;  %s1802_s13 = smov (!%p237_p6), 104  }
   0xd   : > { %s1803_s14 = smov (!%p237_p6), 64   ;;  %s1806_s15 = smov (!%p237_p6), 24  }
  0x10   : > { %v1692_v0 = vld [vmem:[%s2181_s1 + $0x8] sm:$0xff]  ;;  %v1691_v2 = vld [vmem:[%s2181_s1] sm:$0xff]  ;;  %s267_s16 = scalar_select %p266_p7, %s1862_s27, 1  ;;  %vm292_vm0 = vcmask 261120   ;;  %v1804_v22 = vmov 1934713408  }
  0x11   : > { %v1694_v1 = vld [vmem:[%s2183_s3 + $0x8] sm:$0xff]  ;;  %302 = vmatpush.bf16.msra.mxu0 %v1692_v0  ;;  %v1693_v4 = vld [vmem:[%s2183_s3] sm:$0xff]  ;;  %v360_v23 = vunpack.c.l.s4 %v1804_v22  ;;  %vm357_vm1 = vcmask 1047556   ;;  %vm571_vm2 = vcmask 64512   ;;  %vm697_vm3 = vcmask 1041408  }
  0x12   : > { %339 = vmatpush.bf16.msra.mxu1 %v1694_v1  ;;  %s1600_s17 = sshll.u32 %s267_s16, 1  ;;  %v1737_v5 = vld [vmem:[%s2182_s2] ss:$0 sm:$0xff]  ;;  %vm648_vm4 = vcmask 27648   ;;  %vm693_vm5 = vcmask 31744   ;;  %s1808_s16 = smov 16  }
  0x13   : > { %s269_s20 = scalar_lea.vmem %s2180_s0, %s1600_s17  ;;  %v1738_v10 = vld [vmem:[%s2184_s4] ss:$0 sm:$0xff]  ;;  %v1920_v24 = vunpack.c.0.s8 %v360_v23  ;;  %vm844_vm6 = vcmask 130048   ;;  %vm846_vm7 = vcmask 195584   ;;  %vm886_vm8 = vcmask 254976  }
  0x14   : > { %v1892_v3 = vld [vmem:[%s269_s20] sm:$0x3] }
  0x15   : > { %303 = vmatpush.bf16.msra.mxu0 %v1691_v2 }
  0x16   : > { %340 = vmatpush.bf16.msra.mxu1 %v1693_v4 }
  0x18   : > { %1609 = vmatmul.msk.bf16.vlgmr.msra.gmra.mxu0 %vm292_vm0, %v1892_v3 }
  0x95   : > { %v305_v6 = vpop.f32.mrf.mxu0 }
  0x96   : > { %v306_v7 = vadd.f32 %v1737_v5, %v305_v6 }
  0x98   : > { %v309_v8 = vpack.c.bf16 %v306_v7, %v306_v7 }
  0x9a   : > { %1618 = vmatmul.msk.bf16.vlgmr.msra.gmra.mxu1 %vm292_vm0, %v309_v8 }
  0x9d   : > { %v307_v9 = vpop.f32.mrf.mxu0 }
 0x117   : > { %v342_v11 = vpop.f32.mrf.mxu1 }
 0x118   : > { %v343_v12 = vadd.f32 %v1738_v10, %v342_v11 }
 0x11a   : > { %v419_v13 = vpack.c.bf16 %v343_v12, %v343_v12  ;;  %v346_v17 = vmul.f32 0.35355338, %v343_v12 }
 0x11c   : > { %427 = vrot.lane.b32.xlu2 %v419_v13, %s1799_s10  ;;  %421 = vrot.lane.b32.xlu1 %v419_v13, %s1800_s11  ;;  %v347_v18 = vpack.c.bf16 %v346_v17, %v346_v17 }
 0x11d   : > { %423 = vrot.lane.b32.xlu0 %v419_v13, %s1801_s12 }
 0x11f   : > { %v344_v14 = vpop.f32.mrf.mxu1 }
 0x125   : > { %425 = vrot.lane.b32.xlu0 %v419_v13, %s1802_s13 }
 0x176   : > { %v428_v20 = vpop.permute.xlu2 %427 }
 0x18e   : > { %v422_v15 = vpop.permute.xlu1 %421 }
 0x18f   : > { %v424_v16 = vpop.permute.xlu0 %423  ;;  %429 = vrot.lane.b32.xlu0 %v422_v15, %s1799_s10 }
 0x190   : > { %431 = vrot.lane.b32.xlu1 %v424_v16, %s1799_s10 }
 0x197   : > { %v426_v19 = vpop.permute.xlu0 %425  ;;  %349 = vrot.lane.b32.xlu0 %v347_v18, %s1800_s11 }
 0x198   : > { %433 = vrot.lane.b32.xlu2 %v426_v19, %s1799_s10  ;;  %351 = vrot.lane.b32.xlu1 %v347_v18, %s1801_s12 }
 0x19f   : > { %499 = vrot.lane.b32.xlu0 %v419_v13, %s1803_s14 }
 0x1a0   : > { %353 = vrot.lane.b32.xlu2 %v347_v18, %s1802_s13  ;;  %503 = vrot.lane.b32.xlu1 %v424_v16, %s1803_s14 }
 0x1a8   : > { %505 = vrot.lane.b32.xlu2 %v426_v19, %s1803_s14  ;;  %501 = vrot.lane.b32.xlu1 %v422_v15, %s1803_s14 }
 0x1f2   : > { %v434_v21 = vpop.permute.xlu2 %433 }
 0x1f3   : > { %v447_v25 = vrot.slane %v434_v21, 4 }
 0x1fa   : > { %v354_v31 = vpop.permute.xlu2 %353 }
 0x1fb   : > { %v367_v35 = vrot.slane %v354_v31, 4 }
 0x201   : > { %v430_v26 = vpop.permute.xlu0 %429 }
 0x202   : > { %v432_v27 = vpop.permute.xlu1 %431  ;;  %v448_v28 = vsel %vm357_vm1, %v447_v25, %v430_v26  ;;  %v506_v15 = vpop.permute.xlu2 %505 }
 0x203   : > { %v437_v29 = vrot.slane %v432_v27, 4  ;;  %v452_v30 = vperm.slane %v448_v28, %v1920_v24  ;;  %v519_v28 = vrot.slane %v506_v15, 4 }
 0x205   : > { %v438_v32 = vsel %vm357_vm1, %v437_v29, %v428_v20  ;;  %v453_v33 = vrot.slane %v452_v30, 4  ;;  %v459_v54 = vshrl.u32 %v452_v30, 16 }
 0x206   : > { %v442_v34 = vperm.slane %v438_v32, %v1920_v24 }
 0x207   : > { %v454_v37 = vsel %vm357_vm1, 0, %v453_v33 }
 0x208   : > { %v443_v36 = vrot.slane %v442_v34, 4  ;;  %v458_v46 = vshrl.u32 %v442_v34, 16  ;;  %v465_v47 = vshrl.u32 %v454_v37, 16  ;;  %v457_v48 = vpack.i.b16 %v452_v30, %v442_v34 }
 0x209   : > { %v350_v38 = vpop.permute.xlu0 %349 }
 0x20a   : > { %v444_v39 = vsel %vm357_vm1, 0, %v443_v36  ;;  %v368_v40 = vsel %vm357_vm1, %v367_v35, %v350_v38  ;;  %v352_v41 = vpop.permute.xlu1 %351  ;;  %v460_v58 = vpack.i.b16 %v459_v54, %v458_v46 }
 0x20b   : > { %v464_v42 = vshrl.u32 %v444_v39, 16  ;;  %v463_v43 = vpack.i.b16 %v454_v37, %v444_v39  ;;  %v372_v44 = vperm.slane %v368_v40, %v1920_v24  ;;  %v356_v45 = vrot.slane %v352_v41, 4 }
 0x20d   : > { %v469_v49 = vrot.slane %v463_v43, 4  ;;  %v373_v50 = vrot.slane %v372_v44, 4  ;;  %v358_v51 = vsel %vm357_vm1, %v356_v45, %v347_v18  ;;  %v466_v53 = vpack.i.b16 %v465_v47, %v464_v42 }
 0x20e   : > { %v362_v52 = vperm.slane %v358_v51, %v1920_v24  ;;  %v379_v62 = vshrl.u32 %v372_v44, 16 }
 0x20f   : > { %v374_v55 = vsel %vm357_vm1, 0, %v373_v50  ;;  %v470_v56 = vsel %vm357_vm1, %v469_v49, %v457_v48  ;;  %v479_v61 = vrot.slane %v466_v53, 4 }
 0x210   : > { %v363_v57 = vrot.slane %v362_v52, 4  ;;  %v378_v59 = vshrl.u32 %v362_v52, 16  ;;  %v474_v60 = vperm.slane %v470_v56, %v1920_v24  ;;  %v385_v63 = vshrl.u32 %v374_v55, 16 }
 0x211   : > { %v480_v6 = vsel %vm357_vm1, %v479_v61, %v460_v58  ;;  %v377_v7 = vpack.i.b16 %v372_v44, %v362_v52  ;;  %v500_v8 = vpop.permute.xlu0 %499 }
 0x212   : > { %v364_v0 = vsel %vm357_vm1, 0, %v363_v57  ;;  %v504_v1 = vpop.permute.xlu1 %503  ;;  %v484_v9 = vperm.slane %v480_v6, %v1920_v24  ;;  %v475_v10 = vrot.slane %v474_v60, 4  ;;  %v380_v11 = vpack.i.b16 %v379_v62, %v378_v59 }
 0x213   : > { %v383_v2 = vpack.i.b16 %v374_v55, %v364_v0  ;;  %v384_v4 = vshrl.u32 %v364_v0, 16  ;;  %v509_v5 = vrot.slane %v504_v1, 4  ;;  %v490_v18 = vshrl.u32 %v474_v60, 16 }
 0x214   : > { %v489_v17 = vpack.i.b16 %v484_v9, %v474_v60  ;;  %v491_v19 = vshrl.u32 %v484_v9, 16  ;;  %v476_v20 = vsel %vm357_vm1, 0, %v475_v10  ;;  %v485_v21 = vrot.slane %v484_v9, 4 }
 0x215   : > { %v510_v12 = vsel %vm357_vm1, %v509_v5, %v500_v8  ;;  %v386_v13 = vpack.i.b16 %v385_v63, %v384_v4  ;;  %v389_v14 = vrot.slane %v383_v2, 4  ;;  %v496_v35 = vshrl.u32 %v476_v20, 16 }
 0x216   : > { %v514_v16 = vperm.slane %v510_v12, %v1920_v24  ;;  %v576_v26 = vsel %vm571_vm2, %v489_v17, 0  ;;  %v492_v27 = vpack.i.b16 %v491_v19, %v490_v18  ;;  %v486_v29 = vsel %vm357_vm1, 0, %v485_v21 }
 0x217   : > { %v390_v22 = vsel %vm357_vm1, %v389_v14, %v377_v7  ;;  %v399_v23 = vrot.slane %v386_v13, 4  ;;  %585 = vmatpush.bf16.xpose.msra.mxu2 %v576_v26  ;;  %v495_v33 = vpack.i.b16 %v486_v29, %v476_v20  ;;  %v497_v36 = vshrl.u32 %v486_v29, 16 }
 0x218   : > { %v515_v25 = vrot.slane %v514_v16, 4  ;;  %v394_v30 = vperm.slane %v390_v22, %v1920_v24  ;;  %v595_v32 = vsel %vm571_vm2, %v492_v27, 0  ;;  %v530_v61 = vshrl.u32 %v514_v16, 16 }
 0x219   : > { %v400_v31 = vsel %vm357_vm1, %v399_v23, %v380_v11  ;;  %604 = vmatpush.bf16.xpose.msra.mxu3 %v595_v32  ;;  %v614_v40 = vsel %vm571_vm2, %v495_v33, 0  ;;  %v498_v42 = vpack.i.b16 %v497_v36, %v496_v35 }
 0x21a   : > { %v502_v34 = vpop.permute.xlu1 %501  ;;  %v516_v37 = vsel %vm357_vm1, 0, %v515_v25  ;;  %v404_v39 = vperm.slane %v400_v31, %v1920_v24  ;;  %v395_v43 = vrot.slane %v394_v30, 4  ;;  %623 = vmatpush.bf16.xpose.msrb.mxu0 %v614_v40  ;;  %v410_v45 = vshrl.u32 %v394_v30, 16 }
 0x21b   : > { %v520_v38 = vsel %vm357_vm1, %v519_v28, %v502_v34  ;;  %v633_v49 = vsel %vm571_vm2, %v498_v42, 0  ;;  %v536_v53 = vshrl.u32 %v516_v37, 16 }
 0x21c   : > { %v524_v41 = vperm.slane %v520_v38, %v1920_v24  ;;  %v409_v44 = vpack.i.b16 %v404_v39, %v394_v30  ;;  %v411_v46 = vshrl.u32 %v404_v39, 16  ;;  %v405_v47 = vrot.slane %v404_v39, 4  ;;  %642 = vmatpush.bf16.xpose.msrb.mxu1 %v633_v49  ;;  %v1698_v38 = vld [vmem:[%s2181_s1 + $0x18] sm:$0xff]  ;;  %v1697_v39 = vld [vmem:[%s2181_s1 + $0x10] sm:$0xff] }
 0x21d   : > { %v396_v51 = vsel %vm357_vm1, 0, %v395_v43 }
 0x21e   : > { %v525_v48 = vrot.slane %v524_v41, 4  ;;  %v412_v50 = vpack.i.b16 %v411_v46, %v410_v45  ;;  %v406_v52 = vsel %vm357_vm1, 0, %v405_v47  ;;  %v531_v55 = vshrl.u32 %v524_v41, 16  ;;  %1619 = vmatmul.msk.bf16.vlgmr.msra.gmra.mxu2 %vm571_vm2, %v409_v44 }
 0x21f   : > { %v415_v56 = vpack.i.b16 %v406_v52, %v396_v51  ;;  %v416_v59 = vshrl.u32 %v396_v51, 16  ;;  %v417_v60 = vshrl.u32 %v406_v52, 16  ;;  %v529_v62 = vpack.i.b16 %v524_v41, %v514_v16 }
 0x220   : > { %v526_v54 = vsel %vm357_vm1, 0, %v525_v48  ;;  %1620 = vmatmul.msk.bf16.vlgmr.msra.gmra.mxu3 %vm571_vm2, %v412_v50  ;;  %v532_v2 = vpack.i.b16 %v531_v55, %v530_v61 }
 0x221   : > { %v535_v57 = vpack.i.b16 %v526_v54, %v516_v37  ;;  %v537_v58 = vshrl.u32 %v526_v54, 16  ;;  %v418_v1 = vpack.i.b16 %v417_v60, %v416_v59  ;;  %1621 = vmatmul.msk.bf16.vlgmr.msrb.gmra.mxu0 %vm571_vm2, %v415_v56 }
 0x223   : > { %v538_v63 = vpack.i.b16 %v537_v58, %v536_v53  ;;  %v541_v0 = vrot.slane %v535_v57, 4  ;;  %1622 = vmatmul.msk.bf16.vlgmr.msrb.gmra.mxu1 %vm571_vm2, %v418_v1 }
 0x225   : > { %v542_v4 = vsel %vm357_vm1, %v541_v0, %v529_v62  ;;  %v551_v5 = vrot.slane %v538_v63, 4  ;;  %v1700_v0 = vld [vmem:[%s2183_s3 + $0x18] sm:$0xff] }
 0x226   : > { %v546_v6 = vperm.slane %v542_v4, %v1920_v24 }
 0x227   : > { %v552_v7 = vsel %vm357_vm1, %v551_v5, %v532_v2  ;;  %v1699_v2 = vld [vmem:[%s2183_s3 + $0x10] sm:$0xff] }
 0x228   : > { %v556_v8 = vperm.slane %v552_v7, %v1920_v24  ;;  %v547_v9 = vrot.slane %v546_v6, 4  ;;  %v562_v10 = vshrl.u32 %v546_v6, 16 }
 0x22a   : > { %v561_v11 = vpack.i.b16 %v556_v8, %v546_v6  ;;  %v563_v12 = vshrl.u32 %v556_v8, 16  ;;  %v548_v13 = vsel %vm357_vm1, 0, %v547_v9  ;;  %v557_v14 = vrot.slane %v556_v8, 4 }
 0x22b   : > { %v568_v19 = vshrl.u32 %v548_v13, 16 }
 0x22c   : > { %v699_v15 = vsel %vm697_vm3, %v561_v11, 0  ;;  %v564_v16 = vpack.i.b16 %v563_v12, %v562_v10  ;;  %v558_v17 = vsel %vm357_vm1, 0, %v557_v14 }
 0x22d   : > { %708 = vmatpush.bf16.msrb.mxu2 %v699_v15  ;;  %v567_v18 = vpack.i.b16 %v558_v17, %v548_v13  ;;  %v569_v20 = vshrl.u32 %v558_v17, 16 }
 0x22e   : > { %v718_v21 = vsel %vm697_vm3, %v564_v16, 0 }
 0x22f   : > { %727 = vmatpush.bf16.msrb.mxu3 %v718_v21  ;;  %v737_v22 = vsel %vm697_vm3, %v567_v18, 0  ;;  %v570_v23 = vpack.i.b16 %v569_v20, %v568_v19 }
 0x230   : > { %746 = vmatpush.bf16.msra.mxu0 %v737_v22 }
 0x231   : > { %v756_v25 = vsel %vm697_vm3, %v570_v23, 0 }
 0x232   : > { %765 = vmatpush.bf16.msra.mxu1 %v756_v25 }
 0x233   : > { %916 = vmatpush.bf16.msra.mxu3 %v1698_v38 }
 0x234   : > { %955 = vmatpush.bf16.msrb.mxu0 %v1700_v0 }
 0x237   : > { %917 = vmatpush.bf16.msra.mxu3 %v1697_v39  ;;  %v1739_v39 = vld [vmem:[%s2182_s2 + $0x1] ss:$0 sm:$0xff] }
 0x238   : > { %956 = vmatpush.bf16.msrb.mxu0 %v1699_v2 }
 0x29e   : > { %v625_v26 = vpop.f32.mrf.mxu0 }
 0x29f   : > { %v655_v27 = vsel %vm648_vm4, %v625_v26, -inf }
 0x2a0   : > { %v644_v28 = vpop.f32.mrf.mxu1  ;;  %656 = vmax.xlane.f32.xlu0 %v655_v27 }
 0x2a1   : > { %v587_v29 = vpop.f32.mrf.mxu2  ;;  %v658_v37 = vsel %vm648_vm4, %v644_v28, -inf }
 0x2a2   : > { %v649_v30 = vsel %vm648_vm4, %v587_v29, -inf }
 0x2a3   : > { %v606_v31 = vpop.f32.mrf.mxu3  ;;  %650 = vmax.xlane.f32.xlu1 %v649_v30 }
 0x2a4   : > { %v652_v32 = vsel %vm648_vm4, %v606_v31, -inf }
 0x2a5   : > { %653 = vmax.xlane.f32.xlu2 %v652_v32 }
 0x2a6   : > { %v627_v33 = vpop.f32.mrf.mxu0 }
 0x2a8   : > { %v646_v34 = vpop.f32.mrf.mxu1 }
 0x2a9   : > { %v589_v35 = vpop.f32.mrf.mxu2 }
 0x2ab   : > { %v608_v36 = vpop.f32.mrf.mxu3 }
 0x2ad   : > { %659 = vmax.xlane.f32.xlu2 %v658_v37 }
 0x313   : > { %v657_v40 = vpop.xlane.xlu0 %656 }
 0x314   : > { %v663_v41 = vsub.f32 %v625_v26, %v657_v40 }
 0x316   : > { %v651_v42 = vpop.xlane.xlu1 %650  ;;  %v669_v43 = vmul.f32 1.442695, %v663_v41 }
 0x317   : > { %v661_v44 = vsub.f32 %v587_v29, %v651_v42 }
 0x318   : > { %v654_v45 = vpop.xlane.xlu2 %653  ;;  %1743 = vpow2.f32 %v669_v43 }
 0x319   : > { %v665_v46 = vmul.f32 1.442695, %v661_v44  ;;  %v662_v47 = vsub.f32 %v606_v31, %v654_v45 }
 0x31b   : > { %1745 = vpow2.f32 %v665_v46  ;;  %v667_v48 = vmul.f32 1.442695, %v662_v47 }
 0x31d   : > { %1747 = vpow2.f32 %v667_v48 }
 0x31e   : > { %v1744_v49 = vpop.eup %1743 }
 0x31f   : > { %v691_v50 = vpack.c.bf16 %v1744_v49, %v1744_v49  ;;  %v679_v52 = vsel %vm648_vm4, %v1744_v49, 0.0 }
 0x320   : > { %v660_v51 = vpop.xlane.xlu2 %659  ;;  %680 = vadd.xlane.f32.xlu2 %v679_v52 }
 0x321   : > { %v1746_v53 = vpop.eup %1745  ;;  %v664_v54 = vsub.f32 %v644_v28, %v660_v51  ;;  %1625 = vmatmul.msk.bf16.vlgmr.msra.gmra.mxu0 %vm693_vm5, %v691_v50 }
 0x322   : > { %v673_v55 = vsel %vm648_vm4, %v1746_v53, 0.0  ;;  %v689_v56 = vpack.c.bf16 %v1746_v53, %v1746_v53 }
 0x323   : > { %v1748_v57 = vpop.eup %1747  ;;  %v671_v58 = vmul.f32 1.442695, %v664_v54  ;;  %674 = vadd.xlane.f32.xlu0 %v673_v55 }
 0x324   : > { %1623 = vmatmul.msk.bf16.vlgmr.msrb.gmra.mxu2 %vm693_vm5, %v689_v56  ;;  %v690_v59 = vpack.c.bf16 %v1748_v57, %v1748_v57  ;;  %v676_v60 = vsel %vm648_vm4, %v1748_v57, 0.0  ;;  %v1740_v56 = vld [vmem:[%s2184_s4 + $0x1] ss:$0 sm:$0xff] }
 0x325   : > { %1749 = vpow2.f32 %v671_v58 }
 0x326   : > { %1624 = vmatmul.msk.bf16.vlgmr.msrb.gmra.mxu3 %vm693_vm5, %v690_v59 }
 0x328   : > { %677 = vadd.xlane.f32.xlu2 %v676_v60 }
 0x32b   : > { %v1750_v61 = vpop.eup %1749 }
 0x32c   : > { %v692_v62 = vpack.c.bf16 %v1750_v61, %v1750_v61  ;;  %v682_v63 = vsel %vm648_vm4, %v1750_v61, 0.0 }
 0x32d   : > { %683 = vadd.xlane.f32.xlu1 %v682_v63 }
 0x32e   : > { %1626 = vmatmul.msk.bf16.vlgmr.msra.gmra.mxu1 %vm693_vm5, %v692_v62 }
 0x336   : > { %1649 = vmatmul.msk.bf16.vlgmr.msra.gmra.mxu3 %vm292_vm0, %v1892_v3  ;;  %v1805_v3 = vmov 1983009808  }
 0x337   : > { %v779_v10 = vunpack.c.l.s4 %v1805_v3  ;;  %v1695_v3 = vld [vmem:[%s2185_s5] sm:$0xff] }
 0x339   : > { %v1996_v16 = vunpack.c.0.s8 %v779_v10 }
 0x393   : > { %v681_v1 = vpop.xlane.xlu2 %680 }
 0x394   : > { %1751 = vrcp.f32 %v681_v1 }
 0x396   : > { %v675_v4 = vpop.xlane.xlu0 %674 }
 0x397   : > { %1753 = vrcp.f32 %v675_v4 }
 0x39a   : > { %v1752_v7 = vpop.eup %1751 }
 0x39b   : > { %v678_v8 = vpop.xlane.xlu2 %677 }
 0x39d   : > { %v1754_v11 = vpop.eup %1753 }
 0x39e   : > { %v748_v5 = vpop.f32.mrf.mxu0 }
 0x39f   : > { %v773_v9 = vmul.f32 %v1752_v7, %v748_v5 }
 0x3a0   : > { %v684_v6 = vpop.xlane.xlu1 %683 }
 0x3a1   : > { %1755 = vrcp.f32 %v684_v6  ;;  %v775_v14 = vrot.slane %v773_v9, 4  ;;  %v1696_v9 = vld [vmem:[%s2185_s5 + $0x8] sm:$0xff] }
 0x3a2   : > { %1757 = vrcp.f32 %v678_v8  ;;  %878 = vmatpush.bf16.msra.mxu2 %v1696_v9 }
 0x3a6   : > { %v750_v12 = vpop.f32.mrf.mxu0  ;;  %879 = vmatpush.bf16.msra.mxu2 %v1695_v3 }
 0x3a7   : > { %v710_v13 = vpop.f32.mrf.mxu2  ;;  %v1756_v19 = vpop.eup %1755 }
 0x3a8   : > { %v771_v15 = vmul.f32 %v1754_v11, %v710_v13  ;;  %v1758_v22 = vpop.eup %1757 }
 0x3a9   : > { %v729_v17 = vpop.f32.mrf.mxu3 }
 0x3aa   : > { %v777_v18 = vsel %vm357_vm1, %v775_v14, %v771_v15  ;;  %v772_v25 = vmul.f32 %v1758_v22, %v729_v17 }
 0x3ab   : > { %v767_v20 = vpop.f32.mrf.mxu1  ;;  %v781_v23 = vperm.slane %v777_v18, %v1996_v16 }
 0x3ac   : > { %v774_v21 = vmul.f32 %v1756_v19, %v767_v20 }
 0x3ad   : > { %v790_v29 = vrot.slane %v781_v23, 4 }
 0x3ae   : > { %v782_v26 = vrot.slane %v774_v21, 4 }
 0x3af   : > { %v712_v27 = vpop.f32.mrf.mxu2 }
 0x3b0   : > { %v783_v28 = vsel %vm357_vm1, %v782_v26, %v772_v25 }
 0x3b1   : > { %v787_v30 = vperm.slane %v783_v28, %v1996_v16  ;;  %v731_v31 = vpop.f32.mrf.mxu3 }
 0x3b3   : > { %v788_v32 = vrot.slane %v787_v30, 4  ;;  %v791_v33 = vsel %vm357_vm1, %v787_v30, %v790_v29  ;;  %v769_v34 = vpop.f32.mrf.mxu1 }
 0x3b4   : > { %v799_v35 = vperm.slane %v791_v33, %v1920_v24 }
 0x3b5   : > { %v789_v36 = vsel %vm357_vm1, %v788_v32, %v781_v23 }
 0x3b6   : > { %v795_v37 = vperm.slane %v789_v36, %v1920_v24  ;;  %v802_v38 = vrot.slane %v799_v35, 4 }
 0x3b8   : > { %v800_v40 = vrot.slane %v795_v37, 4  ;;  %v803_v41 = vsel %vm357_vm1, 0.0, %v802_v38  ;;  %v804_v42 = vsel %vm357_vm1, %v802_v38, %v795_v37 }
 0x3b9   : > { %v809_v43 = vrot.slane %v803_v41, 4  ;;  %v919_v44 = vpop.f32.mrf.mxu3  ;;  %v808_v45 = vperm.slane %v804_v42, %v1996_v16 }
 0x3ba   : > { %v920_v46 = vadd.f32 %v1739_v39, %v919_v44  ;;  %v801_v47 = vsel %vm357_vm1, 0.0, %v800_v40 }
 0x3bb   : > { %v810_v48 = vsel %vm357_vm1, %v809_v43, %v801_v47  ;;  %v817_v49 = vrot.slane %v808_v45, 4 }
 0x3bc   : > { %v923_v50 = vpack.c.bf16 %v920_v46, %v920_v46  ;;  %v814_v51 = vperm.slane %v810_v48, %v1996_v16 }
 0x3be   : > { %1663 = vmatmul.msk.bf16.vlgmr.msrb.gmra.mxu0 %vm292_vm0, %v923_v50  ;;  %v818_v52 = vsel %vm357_vm1, %v814_v51, %v817_v49  ;;  %v815_v53 = vrot.slane %v814_v51, 4 }
 0x3bf   : > { %v826_v0 = vperm.slane %v818_v52, %v1920_v24 }
 0x3c0   : > { %v816_v54 = vsel %vm357_vm1, %v815_v53, %v808_v45 }
 0x3c1   : > { %v921_v55 = vpop.f32.mrf.mxu3  ;;  %v829_v1 = vrot.slane %v826_v0, 4  ;;  %v2034_v6 = vperm.slane %v816_v54, %v1920_v24 }
 0x3c3   : > { %v830_v2 = vsel %vm357_vm1, 0.0, %v829_v1  ;;  %v827_v7 = vrot.slane %v2034_v6, 4 }
 0x3c5   : > { %v828_v8 = vsel %vm357_vm1, 0.0, %v827_v7 }
 0x43b   : > { %v958_v57 = vpop.f32.mrf.mxu0 }
 0x43c   : > { %v959_v58 = vadd.f32 %v1740_v56, %v958_v57 }
 0x43e   : > { %v1034_v59 = vpack.c.bf16 %v959_v58, %v959_v58  ;;  %v962_v62 = vmul.f32 0.35355338, %v959_v58 }
 0x440   : > { %1036 = vrot.lane.b32.xlu2 %v1034_v59, %s1800_s11  ;;  %1040 = vrot.lane.b32.xlu1 %v1034_v59, %s1802_s13  ;;  %v963_v63 = vpack.c.bf16 %v962_v62, %v962_v62 }
 0x441   : > { %1038 = vrot.lane.b32.xlu0 %v1034_v59, %s1801_s12 }
 0x443   : > { %v960_v60 = vpop.f32.mrf.mxu0 }
 0x449   : > { %1042 = vrot.lane.b32.xlu0 %v1034_v59, %s1799_s10 }
 0x49a   : > { %v1037_v61 = vpop.permute.xlu2 %1036 }
 0x49b   : > { %1044 = vrot.lane.b32.xlu2 %v1037_v61, %s1799_s10 }
 0x4a3   : > { %965 = vrot.lane.b32.xlu2 %v963_v63, %s1800_s11  ;;  %s1807_s11 = smov 8  }
 0x4ab   : > { %840 = vrot.lane.b32.xlu2 %v830_v2, %s1806_s15 }
 0x4b2   : > { %v1041_v4 = vpop.permute.xlu1 %1040 }
 0x4b3   : > { %v1039_v5 = vpop.permute.xlu0 %1038  ;;  %1114 = vrot.lane.b32.xlu2 %v1034_v59, %s1803_s14  ;;  %1048 = vrot.lane.b32.xlu1 %v1041_v4, %s1799_s10 }
 0x4b4   : > { %1046 = vrot.lane.b32.xlu0 %v1039_v5, %s1799_s10 }
 0x4bb   : > { %967 = vrot.lane.b32.xlu1 %v963_v63, %s1801_s12  ;;  %v1043_v10 = vpop.permute.xlu0 %1042 }
 0x4bc   : > { %969 = vrot.lane.b32.xlu0 %v963_v63, %s1802_s13 }
 0x4c3   : > { %832 = vrot.lane.b32.xlu1 %v828_v8, %s1807_s11 }
 0x4c4   : > { %836 = vrot.lane.b32.xlu0 %v826_v0, %s1808_s16 }
 0x4cb   : > { %1118 = vrot.lane.b32.xlu1 %v1039_v5, %s1803_s14 }
 0x4cc   : > { %1120 = vrot.lane.b32.xlu0 %v1041_v4, %s1803_s14 }
 0x4d3   : > { %1116 = vrot.lane.b32.xlu1 %v1037_v61, %s1803_s14  ;;  %s263_s14 = sand.u32 1, %s1789_s24  }
 0x4d4   : > { %s1599_s20 = sshll.u32 %s263_s14, 2 }
 0x4d5   : > { %s2109_s21 = scalar_lea.vmem [#allocation2], %s1599_s20 }
 0x4f5   : > { %v1045_v11 = vpop.permute.xlu2 %1044 }
 0x4fd   : > { %v966_v21 = vpop.permute.xlu2 %965 }
 0x505   : > { %v841_v49 = vpop.permute.xlu2 %840 }
 0x525   : > { %v1049_v12 = vpop.permute.xlu1 %1048 }
 0x526   : > { %v1047_v13 = vpop.permute.xlu0 %1046  ;;  %v1062_v14 = vrot.slane %v1049_v12, 4 }
 0x527   : > { %v1052_v15 = vrot.slane %v1047_v13, 4 }
 0x528   : > { %v1063_v17 = vsel %vm357_vm1, %v1062_v14, %v1045_v11 }
 0x529   : > { %v1053_v18 = vsel %vm357_vm1, %v1052_v15, %v1043_v10  ;;  %v1067_v19 = vperm.slane %v1063_v17, %v1920_v24 }
 0x52a   : > { %v1057_v20 = vperm.slane %v1053_v18, %v1920_v24 }
 0x52b   : > { %v1068_v22 = vrot.slane %v1067_v19, 4  ;;  %v1074_v28 = vshrl.u32 %v1067_v19, 16 }
 0x52c   : > { %v1058_v23 = vrot.slane %v1057_v20, 4  ;;  %v1073_v32 = vshrl.u32 %v1057_v20, 16  ;;  %v1072_v36 = vpack.i.b16 %v1067_v19, %v1057_v20 }
 0x52d   : > { %v1069_v25 = vsel %vm357_vm1, 0, %v1068_v22  ;;  %v968_v26 = vpop.permute.xlu1 %967 }
 0x52e   : > { %v1059_v27 = vsel %vm357_vm1, 0, %v1058_v23  ;;  %v1080_v29 = vshrl.u32 %v1069_v25, 16  ;;  %v970_v30 = vpop.permute.xlu0 %969  ;;  %v972_v31 = vrot.slane %v968_v26, 4  ;;  %v1075_v43 = vpack.i.b16 %v1074_v28, %v1073_v32  ;;  %v1115_v28 = vpop.permute.xlu2 %1114 }
 0x52f   : > { %v1079_v33 = vshrl.u32 %v1059_v27, 16  ;;  %v1078_v34 = vpack.i.b16 %v1069_v25, %v1059_v27  ;;  %v982_v35 = vrot.slane %v970_v30, 4 }
 0x530   : > { %v973_v37 = vsel %vm357_vm1, %v972_v31, %v963_v63 }
 0x531   : > { %v1081_v38 = vpack.i.b16 %v1080_v29, %v1079_v33  ;;  %v1084_v39 = vrot.slane %v1078_v34, 4  ;;  %v983_v40 = vsel %vm357_vm1, %v982_v35, %v966_v21  ;;  %v977_v41 = vperm.slane %v973_v37, %v1920_v24 }
 0x532   : > { %v987_v42 = vperm.slane %v983_v40, %v1920_v24 }
 0x533   : > { %v978_v44 = vrot.slane %v977_v41, 4  ;;  %v1085_v45 = vsel %vm357_vm1, %v1084_v39, %v1072_v36  ;;  %v1094_v46 = vrot.slane %v1081_v38, 4  ;;  %v993_v51 = vshrl.u32 %v977_v41, 16 }
 0x534   : > { %v988_v47 = vrot.slane %v987_v42, 4  ;;  %v1089_v48 = vperm.slane %v1085_v45, %v1920_v24  ;;  %v994_v55 = vshrl.u32 %v987_v42, 16  ;;  %v992_v63 = vpack.i.b16 %v987_v42, %v977_v41 }
 0x535   : > { %v979_v50 = vsel %vm357_vm1, 0, %v978_v44  ;;  %v833_v52 = vpop.permute.xlu1 %832  ;;  %v1095_v53 = vsel %vm357_vm1, %v1094_v46, %v1075_v43 }
 0x536   : > { %v989_v54 = vsel %vm357_vm1, 0, %v988_v47  ;;  %v999_v56 = vshrl.u32 %v979_v50, 16  ;;  %v837_v57 = vpop.permute.xlu0 %836  ;;  %v843_v58 = vsel %vm571_vm2, %v2034_v6, %v833_v52  ;;  %v1099_v62 = vperm.slane %v1095_v53, %v1920_v24 }
 0x537   : > { %v1000_v59 = vshrl.u32 %v989_v54, 16  ;;  %v998_v60 = vpack.i.b16 %v989_v54, %v979_v50  ;;  %v845_v61 = vsel %vm844_vm6, %v843_v58, %v837_v57  ;;  %v1090_v1 = vrot.slane %v1089_v48, 4 }
 0x538   : > { %v847_v0 = vsel %vm846_vm7, %v845_v61, %v841_v49  ;;  %v1104_v7 = vpack.i.b16 %v1099_v62, %v1089_v48  ;;  %v1105_v8 = vshrl.u32 %v1089_v48, 16  ;;  %v1106_v9 = vshrl.u32 %v1099_v62, 16 }
 0x539   : > { %v1001_v2 = vpack.i.b16 %v1000_v59, %v999_v56  ;;  %v1004_v4 = vrot.slane %v998_v60, 4  ;;  %v848_v5 = vpack.c.bf16 %v847_v0, %v847_v0  ;;  %v1091_v3 = vsel %vm357_vm1, 0, %v1090_v1 }
 0x53a   : > { %v1100_v10 = vrot.slane %v1099_v62, 4  ;;  %v995_v6 = vpack.i.b16 %v994_v55, %v993_v51  ;;  %v1190_v13 = vsel %vm571_vm2, %v1104_v7, 0  ;;  %v1107_v15 = vpack.i.b16 %v1106_v9, %v1105_v8 }
 0x53b   : > { %v1005_v11 = vsel %vm357_vm1, %v1004_v4, %v992_v63  ;;  %v1014_v12 = vrot.slane %v1001_v2, 4  ;;  %1635 = vmatmul.msk.bf16.vlgmr.msra.gmra.mxu2 %vm292_vm0, %v848_v5  ;;  %1199 = vmatpush.bf16.xpose.msrb.mxu1 %v1190_v13  ;;  %v1111_v21 = vshrl.u32 %v1091_v3, 16 }
 0x53c   : > { %v1009_v14 = vperm.slane %v1005_v11, %v1920_v24  ;;  %v1101_v17 = vsel %vm357_vm1, 0, %v1100_v10  ;;  %v1209_v23 = vsel %vm571_vm2, %v1107_v15, 0 }
 0x53d   : > { %v1015_v18 = vsel %vm357_vm1, %v1014_v12, %v995_v6  ;;  %v1110_v19 = vpack.i.b16 %v1101_v17, %v1091_v3  ;;  %v1119_v20 = vpop.permute.xlu1 %1118  ;;  %v1112_v22 = vshrl.u32 %v1101_v17, 16  ;;  %1218 = vmatpush.bf16.xpose.msrb.mxu2 %v1209_v23 }
 0x53e   : > { %v1124_v25 = vrot.slane %v1119_v20, 4  ;;  %v1019_v26 = vperm.slane %v1015_v18, %v1920_v24  ;;  %v1010_v27 = vrot.slane %v1009_v14, 4  ;;  %v1121_v35 = vpop.permute.xlu0 %1120  ;;  %v1025_v49 = vshrl.u32 %v1009_v14, 16 }
 0x53f   : > { %v1228_v29 = vsel %vm571_vm2, %v1110_v19, 0  ;;  %v1113_v30 = vpack.i.b16 %v1112_v22, %v1111_v21  ;;  %v1134_v42 = vrot.slane %v1121_v35, 4  ;;  %v1741_v21 = vld [vmem:[%s2186_s6] ss:$0 sm:$0xff] }
 0x540   : > { %1237 = vmatpush.bf16.xpose.msrb.mxu3 %v1228_v29  ;;  %v1125_v31 = vsel %vm357_vm1, %v1124_v25, %v1115_v28  ;;  %v1024_v32 = vpack.i.b16 %v1019_v26, %v1009_v14  ;;  %v1011_v33 = vsel %vm357_vm1, 0, %v1010_v27  ;;  %v1020_v34 = vrot.slane %v1019_v26, 4 }
 0x541   : > { %v1129_v36 = vperm.slane %v1125_v31, %v1920_v24  ;;  %v1247_v37 = vsel %vm571_vm2, %v1113_v30, 0  ;;  %v1031_v40 = vshrl.u32 %v1011_v33, 16  ;;  %v1026_v46 = vshrl.u32 %v1019_v26, 16 }
 0x542   : > { %1256 = vmatpush.bf16.xpose.msra.mxu0 %v1247_v37  ;;  %v1021_v38 = vsel %vm357_vm1, 0, %v1020_v34  ;;  %1664 = vmatmul.msk.bf16.vlgmr.msrb.gmra.mxu1 %vm571_vm2, %v1024_v32 }
 0x543   : > { %v1030_v39 = vpack.i.b16 %v1021_v38, %v1011_v33  ;;  %v1032_v41 = vshrl.u32 %v1021_v38, 16  ;;  %v1130_v43 = vrot.slane %v1129_v36, 4  ;;  %v1027_v52 = vpack.i.b16 %v1026_v46, %v1025_v49 }
 0x544   : > { %v1145_v58 = vshrl.u32 %v1129_v36, 16 }
 0x545   : > { %v1117_v44 = vpop.permute.xlu1 %1116  ;;  %v1033_v45 = vpack.i.b16 %v1032_v41, %v1031_v40  ;;  %v1131_v50 = vsel %vm357_vm1, 0, %v1130_v43 }
 0x546   : > { %v1135_v47 = vsel %vm357_vm1, %v1134_v42, %v1117_v44  ;;  %v1151_v54 = vshrl.u32 %v1131_v50, 16 }
 0x547   : > { %1666 = vmatmul.msk.bf16.vlgmr.msrb.gmra.mxu3 %vm571_vm2, %v1030_v39  ;;  %v1139_v48 = vperm.slane %v1135_v47, %v1920_v24 }
 0x549   : > { %v1140_v51 = vrot.slane %v1139_v48, 4  ;;  %1667 = vmatmul.msk.bf16.vlgmr.msra.gmra.mxu0 %vm571_vm2, %v1033_v45  ;;  %v1146_v55 = vshrl.u32 %v1139_v48, 16  ;;  %v1144_v59 = vpack.i.b16 %v1139_v48, %v1129_v36 }
 0x54b   : > { %v1141_v53 = vsel %vm357_vm1, 0, %v1140_v51  ;;  %1665 = vmatmul.msk.bf16.vlgmr.msrb.gmra.mxu2 %vm571_vm2, %v1027_v52  ;;  %v1147_v62 = vpack.i.b16 %v1146_v55, %v1145_v58 }
 0x54c   : > { %v1150_v56 = vpack.i.b16 %v1141_v53, %v1131_v50  ;;  %v1152_v57 = vshrl.u32 %v1141_v53, 16 }
 0x54e   : > { %v1153_v60 = vpack.i.b16 %v1152_v57, %v1151_v54  ;;  %v1156_v61 = vrot.slane %v1150_v56, 4 }
 0x550   : > { %v1166_v63 = vrot.slane %v1153_v60, 4  ;;  %v1157_v0 = vsel %vm357_vm1, %v1156_v61, %v1144_v59 }
 0x551   : > { %v1161_v1 = vperm.slane %v1157_v0, %v1920_v24 }
 0x552   : > { %v1167_v2 = vsel %vm357_vm1, %v1166_v63, %v1147_v62 }
 0x553   : > { %v1171_v4 = vperm.slane %v1167_v2, %v1920_v24  ;;  %v1162_v5 = vrot.slane %v1161_v1, 4  ;;  %v1177_v7 = vshrl.u32 %v1161_v1, 16 }
 0x555   : > { %v1176_v8 = vpack.i.b16 %v1171_v4, %v1161_v1  ;;  %v1178_v9 = vshrl.u32 %v1171_v4, 16  ;;  %v1163_v3 = vsel %vm357_vm1, 0, %v1162_v5  ;;  %v1172_v10 = vrot.slane %v1171_v4, 4 }
 0x556   : > { %v1183_v14 = vshrl.u32 %v1163_v3, 16 }
 0x557   : > { %v1310_v6 = vsel %vm697_vm3, %v1176_v8, 0  ;;  %v1179_v11 = vpack.i.b16 %v1178_v9, %v1177_v7  ;;  %v1173_v12 = vsel %vm357_vm1, 0, %v1172_v10 }
 0x558   : > { %1319 = vmatpush.bf16.msra.mxu1 %v1310_v6  ;;  %v1182_v13 = vpack.i.b16 %v1173_v12, %v1163_v3  ;;  %v1184_v15 = vshrl.u32 %v1173_v12, 16 }
 0x559   : > { %v1329_v17 = vsel %vm697_vm3, %v1179_v11, 0 }
 0x55a   : > { %1338 = vmatpush.bf16.msra.mxu2 %v1329_v17  ;;  %v1348_v18 = vsel %vm697_vm3, %v1182_v13, 0  ;;  %v1185_v19 = vpack.i.b16 %v1184_v15, %v1183_v14 }
 0x55b   : > { %1357 = vmatpush.bf16.msra.mxu3 %v1348_v18 }
 0x55c   : > { %v1367_v20 = vsel %vm697_vm3, %v1185_v19, 0 }
 0x55d   : > { %1376 = vmatpush.bf16.msrb.mxu0 %v1367_v20 }
 0x5be   : > { %v881_v22 = vpop.f32.mrf.mxu2 }
 0x5bf   : > { %v882_v23 = vadd.f32 %v1741_v21, %v881_v22  ;;  %v1201_v25 = vpop.f32.mrf.mxu1 }
 0x5c0   : > { %v1262_v27 = vsel %vm648_vm4, %v1201_v25, -inf }
 0x5c1   : > { %v885_v26 = vpack.c.bf16 %v882_v23, %v882_v23  ;;  %1263 = vmax.xlane.f32.xlu1 %v1262_v27 }
 0x5c3   : > { %887 = vst.msk [vmem:[%s2109_s21] sm:$0x3] %vm886_vm8, %v885_v26 }
 0x5c6   : > { %v1258_v28 = vpop.f32.mrf.mxu0  ;;  %v883_v29 = vpop.f32.mrf.mxu2 }
 0x5c7   : > { %v1203_v30 = vpop.f32.mrf.mxu1  ;;  %v1271_v37 = vsel %vm648_vm4, %v1258_v28, -inf }
 0x5ca   : > { %v1239_v31 = vpop.f32.mrf.mxu3 }
 0x5cb   : > { %v1268_v32 = vsel %vm648_vm4, %v1239_v31, -inf }
 0x5cc   : > { %1269 = vmax.xlane.f32.xlu0 %v1268_v32 }
 0x5ce   : > { %v1260_v33 = vpop.f32.mrf.mxu0  ;;  %v1220_v34 = vpop.f32.mrf.mxu2 }
 0x5cf   : > { %v1265_v35 = vsel %vm648_vm4, %v1220_v34, -inf }
 0x5d0   : > { %1266 = vmax.xlane.f32.xlu2 %v1265_v35 }
 0x5d2   : > { %v1241_v36 = vpop.f32.mrf.mxu3 }
 0x5d4   : > { %1272 = vmax.xlane.f32.xlu0 %v1271_v37 }
 0x5d6   : > { %v1222_v38 = vpop.f32.mrf.mxu2 }
 0x634   : > { %v1264_v39 = vpop.xlane.xlu1 %1263 }
 0x635   : > { %v1274_v40 = vsub.f32 %v1201_v25, %v1264_v39 }
 0x637   : > { %v1278_v41 = vmul.f32 1.442695, %v1274_v40 }
 0x639   : > { %1759 = vpow2.f32 %v1278_v41 }
 0x63f   : > { %v1270_v42 = vpop.xlane.xlu0 %1269  ;;  %v1760_v43 = vpop.eup %1759 }
 0x640   : > { %v1276_v44 = vsub.f32 %v1239_v31, %v1270_v42  ;;  %v1302_v45 = vpack.c.bf16 %v1760_v43, %v1760_v43  ;;  %v1286_v46 = vsel %vm648_vm4, %v1760_v43, 0.0 }
 0x641   : > { %1287 = vadd.xlane.f32.xlu1 %v1286_v46 }
 0x642   : > { %v1282_v47 = vmul.f32 1.442695, %v1276_v44  ;;  %1668 = vmatmul.msk.bf16.vlgmr.msra.gmra.mxu1 %vm693_vm5, %v1302_v45 }
 0x643   : > { %v1267_v48 = vpop.xlane.xlu2 %1266 }
 0x644   : > { %1761 = vpow2.f32 %v1282_v47  ;;  %v1275_v49 = vsub.f32 %v1220_v34, %v1267_v48 }
 0x646   : > { %v1280_v50 = vmul.f32 1.442695, %v1275_v49 }
 0x647   : > { %v1273_v51 = vpop.xlane.xlu0 %1272 }
 0x648   : > { %1763 = vpow2.f32 %v1280_v50  ;;  %v1277_v52 = vsub.f32 %v1258_v28, %v1273_v51 }
 0x64a   : > { %v1762_v53 = vpop.eup %1761  ;;  %v1284_v54 = vmul.f32 1.442695, %v1277_v52  ;;  %v1701_v52 = vld [vmem:[%s2185_s5 + $0x10] sm:$0xff] }
 0x64b   : > { %v1304_v55 = vpack.c.bf16 %v1762_v53, %v1762_v53  ;;  %v1292_v56 = vsel %vm648_vm4, %v1762_v53, 0.0 }
 0x64c   : > { %1765 = vpow2.f32 %v1284_v54  ;;  %1293 = vadd.xlane.f32.xlu2 %v1292_v56 }
 0x64d   : > { %1670 = vmatmul.msk.bf16.vlgmr.msra.gmra.mxu3 %vm693_vm5, %v1304_v55 }
 0x64e   : > { %v1764_v57 = vpop.eup %1763 }
 0x64f   : > { %v1303_v58 = vpack.c.bf16 %v1764_v57, %v1764_v57  ;;  %v1289_v59 = vsel %vm648_vm4, %v1764_v57, 0.0 }
 0x651   : > { %1669 = vmatmul.msk.bf16.vlgmr.msra.gmra.mxu2 %vm693_vm5, %v1303_v58 }
 0x652   : > { %v1766_v60 = vpop.eup %1765 }
 0x653   : > { %v1305_v61 = vpack.c.bf16 %v1766_v60, %v1766_v60  ;;  %v1295_v62 = vsel %vm648_vm4, %v1766_v60, 0.0 }
 0x654   : > { %1296 = vadd.xlane.f32.xlu0 %v1295_v62  ;;  %1290 = vadd.xlane.f32.xlu2 %v1289_v59  ;;  %v1742_v59 = vld [vmem:[%s2186_s6 + $0x1] ss:$0 sm:$0xff] }
 0x655   : > { %1671 = vmatmul.msk.bf16.vlgmr.msrb.gmra.mxu0 %vm693_vm5, %v1305_v61 }
 0x6b4   : > { %v1288_v1 = vpop.xlane.xlu1 %1287 }
 0x6bf   : > { %v1321_v63 = vpop.f32.mrf.mxu1  ;;  %v1294_v0 = vpop.xlane.xlu2 %1293 }
 0x6c0   : > { %1767 = vrcp.f32 %v1294_v0  ;;  %v1523_v0 = vld [vmem:[%s2109_s21] sm:$0x3] (%p1874_p4) }
 0x6c1   : > { %1769 = vrcp.f32 %v1288_v1 }
 0x6c6   : > { %v1768_v7 = vpop.eup %1767 }
 0x6c7   : > { %v1323_v2 = vpop.f32.mrf.mxu1  ;;  %v1297_v4 = vpop.xlane.xlu0 %1296 }
 0x6c8   : > { %v1291_v5 = vpop.xlane.xlu2 %1290  ;;  %1771 = vrcp.f32 %v1297_v4  ;;  %v1770_v9 = vpop.eup %1769 }
 0x6c9   : > { %1773 = vrcp.f32 %v1291_v5  ;;  %v1382_v11 = vmul.f32 %v1770_v9, %v1321_v63 }
 0x6ce   : > { %v1772_v10 = vpop.eup %1771 }
 0x6cf   : > { %v1774_v14 = vpop.eup %1773 }
 0x6d0   : > { %v1359_v8 = vpop.f32.mrf.mxu3 }
 0x6d1   : > { %v1384_v3 = vmul.f32 %v1768_v7, %v1359_v8 }
 0x6d2   : > { %v1378_v6 = vpop.f32.mrf.mxu0 }
 0x6d3   : > { %v1386_v12 = vrot.slane %v1384_v3, 4  ;;  %v1385_v13 = vmul.f32 %v1772_v10, %v1378_v6 }
 0x6d4   : > { %v1340_v15 = vpop.f32.mrf.mxu2 }
 0x6d5   : > { %v1387_v17 = vsel %vm357_vm1, %v1386_v12, %v1382_v11  ;;  %v1392_v18 = vrot.slane %v1385_v13, 4  ;;  %v1383_v19 = vmul.f32 %v1774_v14, %v1340_v15 }
 0x6d6   : > { %v1391_v20 = vperm.slane %v1387_v17, %v1996_v16 }
 0x6d7   : > { %v1393_v21 = vsel %vm357_vm1, %v1392_v18, %v1383_v19 }
 0x6d8   : > { %v1400_v22 = vrot.slane %v1391_v20, 4  ;;  %v1397_v23 = vperm.slane %v1393_v21, %v1996_v16  ;;  %v1361_v25 = vpop.f32.mrf.mxu3 }
 0x6da   : > { %v1398_v26 = vrot.slane %v1397_v23, 4  ;;  %v1401_v27 = vsel %vm357_vm1, %v1397_v23, %v1400_v22  ;;  %v1380_v28 = vpop.f32.mrf.mxu0 }
 0x6db   : > { %v1409_v29 = vperm.slane %v1401_v27, %v1920_v24 }
 0x6dc   : > { %v1399_v30 = vsel %vm357_vm1, %v1398_v26, %v1391_v20  ;;  %v1342_v31 = vpop.f32.mrf.mxu2 }
 0x6dd   : > { %v1405_v32 = vperm.slane %v1399_v30, %v1920_v24  ;;  %v1412_v33 = vrot.slane %v1409_v29, 4 }
 0x6df   : > { %v1413_v34 = vsel %vm357_vm1, 0.0, %v1412_v33  ;;  %v1410_v35 = vrot.slane %v1405_v32, 4  ;;  %v1414_v36 = vsel %vm357_vm1, %v1412_v33, %v1405_v32 }
 0x6e0   : > { %v1419_v37 = vrot.slane %v1413_v34, 4  ;;  %v1418_v38 = vperm.slane %v1414_v36, %v1996_v16 }
 0x6e1   : > { %v1411_v39 = vsel %vm357_vm1, 0.0, %v1410_v35 }
 0x6e2   : > { %v1420_v40 = vsel %vm357_vm1, %v1419_v37, %v1411_v39  ;;  %v1427_v41 = vrot.slane %v1418_v38, 4 }
 0x6e3   : > { %v1424_v42 = vperm.slane %v1420_v40, %v1996_v16  ;;  %v1702_v16 = vld [vmem:[%s2185_s5 + $0x18] sm:$0xff] }
 0x6e4   : > { %1488 = vmatpush.bf16.msrb.mxu1 %v1702_v16 }
 0x6e5   : > { %v1428_v43 = vsel %vm357_vm1, %v1424_v42, %v1427_v41  ;;  %v1425_v44 = vrot.slane %v1424_v42, 4 }
 0x6e6   : > { %v1436_v45 = vperm.slane %v1428_v43, %v1920_v24 }
 0x6e7   : > { %v1426_v46 = vsel %vm357_vm1, %v1425_v44, %v1418_v38 }
 0x6e8   : > { %1446 = vrot.lane.b32.xlu0 %v1436_v45, %s1808_s16  ;;  %v1439_v47 = vrot.slane %v1436_v45, 4  ;;  %v1432_v48 = vperm.slane %v1426_v46, %v1920_v24  ;;  %1489 = vmatpush.bf16.msrb.mxu1 %v1701_v52 }
 0x6ea   : > { %v1440_v49 = vsel %vm357_vm1, 0.0, %v1439_v47  ;;  %v1437_v50 = vrot.slane %v1432_v48, 4 }
 0x6eb   : > { %1450 = vrot.lane.b32.xlu2 %v1440_v49, %s1806_s15  ;;  %s1688_s15 = sshll.u32 (%p1874_p4), %s1862_s27, 1 }
 0x6ec   : > { %v1438_v51 = vsel %vm357_vm1, 0.0, %v1437_v50  ;;  %s1506_s10 = scalar_lea.vmem (%p1874_p4), %s2187_s7, %s1688_s15 }
 0x6ed   : > { %1442 = vrot.lane.b32.xlu1 %v1438_v51, %s1807_s11  ;;  %1524 = vst [vmem:[%s1506_s10] sm:$0x3] (%p1874_p4), %v1523_v0 }
 0x745   : > { %v1451_v55 = vpop.permute.xlu2 %1450 }
 0x75a   : > { %v1447_v53 = vpop.permute.xlu0 %1446 }
 0x75f   : > { %v1443_v24 = vpop.permute.xlu1 %1442 }
 0x760   : > { %v1453_v54 = vsel %vm571_vm2, %v1432_v48, %v1443_v24 }
 0x761   : > { %v1454_v56 = vsel %vm844_vm6, %v1453_v54, %v1447_v53 }
 0x762   : > { %v1455_v57 = vsel %vm846_vm7, %v1454_v56, %v1451_v55 }
 0x763   : > { %v1456_v58 = vpack.c.bf16 %v1455_v57, %v1455_v57 }
 0x765   : > { %1685 = vmatmul.msk.bf16.vlgmr.msrb.gmra.mxu1 %vm292_vm0, %v1456_v58 }
 0x7e2   : > { %v1491_v60 = vpop.f32.mrf.mxu1 }
 0x7e3   : > { %v1492_v61 = vadd.f32 %v1742_v59, %v1491_v60 }
 0x7e5   : > { %v1495_v62 = vpack.c.bf16 %v1492_v61, %v1492_v61 }
 0x7e6   : > { %1504 = sbr.rel (!%p1874_p4) target bundleno = 2032 (0x7f0), region = 52 }
 0x7e7   : > { %1686 = vst.msk [vmem:[%s2109_s21 + $0x2] sm:$0x3] %vm886_vm8, %v1495_v62 }
 0x7ea   : > { %v1493_v63 = vpop.f32.mrf.mxu1 }
 0x7ee   : > { %v1525_v1 = vld [vmem:[%s2109_s21 + $0x2] sm:$0x3] }
 0x7ef   : > { %1526 = vst [vmem:[%s1506_s10 + $0x4] sm:$0x3] %v1525_v1 }
 0x7f0 PF: > { %p14_p8 = scmp.ge.s32.totalorder %s1864_s28, 4   ;;  %s2189_s24 = smov %s1793_s25 }
 0x7f1   : > { %s2190_s25 = smov %s1872_s8  ;;  %s2191_s26 = smov %s1864_s28 }
 0x7f2   :  { %16 = sbr.rel (!%p14_p8) target bundleno = 2 (0x2), region = 119 }

</bundles_post_ra>
